<compile_context>
chip_gen: v7x
topology: tpu7x:2x2x1
jax: 0.10.0
libtpu: 0.0.40
codegen_flags: <defaults>
</compile_context>

<pallas_src>
import functools

import jax
import jax.numpy as jnp
from jax.experimental import pallas as pl
from jax.experimental.pallas import tpu as pltpu

BN_EPS = 1e-5
LEAKY_SLOPE = 0.1
LANE = 128
SUBLANE = 8


def autopad(k, p=None):
    if p is None:
        p = k // 2 if isinstance(k, int) else [x // 2 for x in k]
    return p


def _round_up(x, m):
    return (x + m - 1) // m * m


def _vmem_limit_bytes():
    """Scoped-VMEM request sized from the actual part (v7x has only 64 MiB/TC)."""
    try:
        cap = getattr(pltpu.get_tpu_info(), "vmem_capacity_bytes", None)
    except Exception:
        cap = None
    if not cap:
        cap = 64 * 1024 * 1024          # conservative default = v7x per-core VMEM
    return int(min(100 * 1024 * 1024, max(32 * 1024 * 1024, cap - 16 * 1024 * 1024)))


def _pick_tile_h(Ho, Wo, C2p, resident_bytes, vmem_limit, target_rows=1024):
    """Largest divisor of Ho whose tile (~th*Wo matmul rows) fits the VMEM budget."""
    budget = max(vmem_limit // 2 - resident_bytes, 1 << 20)
    per_row = C2p * (4 + 2 * 2 + 4)      # f32 acc + double-buffered bf16 y + slack
    rows_cap = max(Wo, budget // per_row)
    rows_target = int(min(rows_cap, target_rows))
    th_cap = max(1, rows_target // Wo)
    th = 1
    for d in range(1, Ho + 1):
        if Ho % d == 0 and d <= th_cap:
            th = d
    return th


# ---------------------------------------------------------------------------
# Pass 1: in-kernel patch extraction -> tap-wise MXU matmuls + per-tile stats.
# ---------------------------------------------------------------------------
def _conv_stats_kernel(x_ref, w_ref, y_ref, sum_ref, sq_ref, *, k, s, th, wo):
    # x_ref:   (1, Hp, Wp, C1)       bf16 zero-padded NHWC image (resident per image)
    # w_ref:   (k*k, C1, C2p)        bf16 tap-major weights (resident)
    # y_ref:   (1, th, wo, C2p)      bf16 conv output tile
    # sum_ref: (1, 1, 8, C2p)        f32 per-tile partial sum      (row-broadcast)
    # sq_ref:  (1, 1, 8, C2p)        f32 per-tile partial sum(y^2) (row-broadcast)
    c1 = w_ref.shape[1]
    c2p = w_ref.shape[2]
    r = pl.program_id(1)
    row0 = pl.multiple_of(r * (th * s), th * s)

    acc = jnp.zeros((th * wo, c2p), jnp.float32)
    for di in range(k):                       # k*k taps, unrolled (K-tiling by tap)
        for dj in range(k):
            if s == 1:
                a = x_ref[0, pl.ds(row0 + di, th), pl.ds(dj, wo), :]
            else:
                a = x_ref[0, pl.ds(row0 + di, th, stride=s),
                          pl.ds(dj, wo, stride=s), :]
            acc = acc + jnp.dot(a.reshape(th * wo, c1), w_ref[di * k + dj],
                                preferred_element_type=jnp.float32)

    y_ref[...] = acc.reshape(1, th, wo, c2p).astype(y_ref.dtype)
    srow = jnp.sum(acc, axis=0, keepdims=True)            # f32 stats from f32 acc
    qrow = jnp.sum(acc * acc, axis=0, keepdims=True)
    sum_ref[...] = jnp.broadcast_to(srow.reshape(1, 1, 1, c2p), (1, 1, 8, c2p))
    sq_ref[...] = jnp.broadcast_to(qrow.reshape(1, 1, 1, c2p), (1, 1, 8, c2p))


# ---------------------------------------------------------------------------
# Pass 2: streaming BN affine (precomputed scale/shift) + LeakyReLU(0.1).
# ---------------------------------------------------------------------------
def _bn_act_kernel(y_ref, scale_ref, shift_ref, o_ref):
    scale = scale_ref[...].reshape(1, 1, 1, -1)
    shift = shift_ref[...].reshape(1, 1, 1, -1)
    z = y_ref[...].astype(jnp.float32) * scale + shift
    o_ref[...] = jnp.where(z >= 0, z, LEAKY_SLOPE * z).astype(o_ref.dtype)


def conv_bn_act(x, weight, gamma, beta, *, k, s=1, p=None, g=1,
                tile_h=None, mxu_dtype=jnp.bfloat16):
    """x: (N, C1, H, W) f32; weight: (C2, C1, k, k); gamma/beta: (C2,). Returns NCHW f32."""
    assert g == 1  # TODO(synk): grouped conv (g > 1) not implemented
    N, C1, H, W = x.shape
    C2 = weight.shape[0]
    p = autopad(k, p)
    Ho = (H + 2 * p - k) // s + 1
    Wo = (W + 2 * p - k) // s + 1
    M = N * Ho * Wo
    Hp, Wp = H + 2 * p, W + 2 * p
    C2p = _round_up(C2, LANE)
    itemsize = jnp.dtype(mxu_dtype).itemsize

    # --- glue: single traversal of the input (no k^2 im2col blowup) ----------
    x_pad = jnp.pad(jnp.transpose(x, (0, 2, 3, 1)),
                    ((0, 0), (p, p), (p, p), (0, 0))).astype(mxu_dtype)
    w_taps = jnp.transpose(weight, (2, 3, 1, 0)).reshape(k * k, C1, C2)
    w_p = jnp.zeros((k * k, C1, C2p), mxu_dtype).at[:, :, :C2].set(
        w_taps.astype(mxu_dtype))

    vmem_limit = _vmem_limit_bytes()
    # VMEM footprint of the resident blocks (lane dim pads to 128, sublane to 8).
    img_vmem = Hp * _round_up(Wp, SUBLANE) * _round_up(C1, LANE) * itemsize
    w_vmem = k * k * _round_up(C1, SUBLANE) * C2p * itemsize
    resident = 2 * (img_vmem + w_vmem)           # pipeline double-buffers them
    if tile_h is None:
        tile_h = _pick_tile_h(Ho, Wo, C2p, resident, vmem_limit)
    assert Ho % tile_h == 0, (Ho, tile_h)        # keeps BN stats exact (no pad rows)
    R = Ho // tile_h
    grid = (N, R)

    # ----------------------- pass 1: conv + partial stats ---------------------
    y_full, part_sum, part_sq = pl.pallas_call(
        functools.partial(_conv_stats_kernel, k=k, s=s, th=tile_h, wo=Wo),
        out_shape=(
            jax.ShapeDtypeStruct((N, Ho, Wo, C2p), mxu_dtype),       # bf16 intermediate
            jax.ShapeDtypeStruct((N, R, SUBLANE, C2p), jnp.float32),
            jax.ShapeDtypeStruct((N, R, SUBLANE, C2p), jnp.float32),
        ),
        grid=grid,
        in_specs=[
            pl.BlockSpec((1, Hp, Wp, C1), lambda n, r: (n, 0, 0, 0)),
            pl.BlockSpec((k * k, C1, C2p), lambda n, r: (0, 0, 0)),
        ],
        out_specs=(
            pl.BlockSpec((1, tile_h, Wo, C2p), lambda n, r: (n, r, 0, 0)),
            pl.BlockSpec((1, 1, SUBLANE, C2p), lambda n, r: (n, r, 0, 0)),
            pl.BlockSpec((1, 1, SUBLANE, C2p), lambda n, r: (n, r, 0, 0)),
        ),
        compiler_params=pltpu.CompilerParams(
            dimension_semantics=("parallel", "parallel"),
            vmem_limit_bytes=vmem_limit,
        ),
    )(x_pad, w_p)

    # --- BN finalize: tiny (C2p,) math once, outside the streaming passes -----
    ch_sum = jnp.sum(part_sum[:, :, 0, :], axis=(0, 1))
    ch_sq = jnp.sum(part_sq[:, :, 0, :], axis=(0, 1))
    gamma_p = jnp.zeros((C2p,), jnp.float32).at[:C2].set(gamma.astype(jnp.float32))
    beta_p = jnp.zeros((C2p,), jnp.float32).at[:C2].set(beta.astype(jnp.float32))
    inv_m = 1.0 / float(M)
    mean = ch_sum * inv_m
    var = jnp.maximum(ch_sq * inv_m - mean * mean, 0.0)
    scale_vec = gamma_p * jax.lax.rsqrt(var + BN_EPS)
    shift_vec = beta_p - mean * scale_vec
    scale = scale_vec.reshape(1, C2p)
    shift = shift_vec.reshape(1, C2p)

    # ----------------------- pass 2: affine + LeakyReLU ------------------------
    out_nhwc = pl.pallas_call(
        _bn_act_kernel,
        out_shape=jax.ShapeDtypeStruct((N, Ho, Wo, C2p), jnp.float32),
        grid=grid,
        in_specs=[
            pl.BlockSpec((1, tile_h, Wo, C2p), lambda n, r: (n, r, 0, 0)),
            pl.BlockSpec((1, C2p), lambda n, r: (0, 0)),
            pl.BlockSpec((1, C2p), lambda n, r: (0, 0)),
        ],
        out_specs=pl.BlockSpec((1, tile_h, Wo, C2p), lambda n, r: (n, r, 0, 0)),
        compiler_params=pltpu.CompilerParams(
            dimension_semantics=("parallel", "parallel"),
            vmem_limit_bytes=vmem_limit,
        ),
    )(y_full, scale, shift)

    # slice channel padding, back to NCHW (module interface)
    return jnp.transpose(out_nhwc[:, :, :, :C2], (0, 3, 1, 2))


def _reference(x, weight, gamma, beta, *, k, s=1, p=None, mxu_dtype=jnp.bfloat16):
    """Pure-JAX reference of Conv.forward, conv at the same MXU precision."""
    p = autopad(k, p)
    y = jax.lax.conv_general_dilated(
        x.astype(mxu_dtype), weight.astype(mxu_dtype),
        window_strides=(s, s), padding=((p, p), (p, p)),
        dimension_numbers=("NCHW", "OIHW", "NCHW"),
        preferred_element_type=jnp.float32)
    mean = y.mean(axis=(0, 2, 3), keepdims=True)
    var = jnp.square(y - mean).mean(axis=(0, 2, 3), keepdims=True)
    z = (y - mean) * jax.lax.rsqrt(var + BN_EPS)
    z = z * gamma.reshape(1, -1, 1, 1) + beta.reshape(1, -1, 1, 1)
    return jnp.where(z >= 0, z, LEAKY_SLOPE * z)


if __name__ == "__main__":
    # Small shapes consistent with the module: c1=4, c2=8, k=3, s=1, p=autopad=1
    N, C1, H, W = 2, 4, 16, 16
    C2, K = 8, 3

    key = jax.random.PRNGKey(0)
    kx, kw, kg, kb = jax.random.split(key, 4)
    x = jax.random.normal(kx, (N, C1, H, W), dtype=jnp.float32)
    weight = jax.random.normal(kw, (C2, C1, K, K), dtype=jnp.float32) * 0.1
    gamma = 1.0 + 0.1 * jax.random.normal(kg, (C2,), dtype=jnp.float32)
    beta = 0.1 * jax.random.normal(kb, (C2,), dtype=jnp.float32)

    # tile_h=8 -> grid (2 images x 2 row-tiles): exercises the per-tile
    # partial-stat reduction and the dynamic row-offset tap extraction.
    out = conv_bn_act(x, weight, gamma, beta, k=K, s=1, p=None, g=1, tile_h=8)
    out = jax.block_until_ready(out)

    ref = _reference(x, weight, gamma, beta, k=K, s=1, p=None)
    assert out.shape == (N, C2, H, W), out.shape
    # 2e-2 tolerance covers the bf16 conv intermediate (perf choice) on top of
    # the bf16-MXU conv itself; observed max error is well below this.
    err = float(jnp.abs(out - ref).max())
    assert jnp.allclose(out, ref, atol=2e-2, rtol=2e-2), err

    print("KERNEL_OK")
</pallas_src>

<mosaic_0001>
module attributes {stable_mosaic.version = 11 : i64} {
  func.func @_conv_stats_kernel(%arg0: i32, %arg1: i32, %arg2: memref<1x18x18x4xbf16, #tpu.memory_space<vmem>>, %arg3: memref<9x4x128xbf16, #tpu.memory_space<vmem>>, %arg4: memref<1x8x16x128xbf16, #tpu.memory_space<vmem>>, %arg5: memref<1x1x8x128xf32, #tpu.memory_space<vmem>>, %arg6: memref<1x1x8x128xf32, #tpu.memory_space<vmem>>) attributes {dimension_semantics = [#tpu.dimension_semantics<parallel>, #tpu.dimension_semantics<parallel>], iteration_bounds = array<i64: 2, 2>, scalar_prefetch = 0 : i64, scratch_operands = 0 : i64, tpu.core_type = #tpu.core_type<tc>, window_params = [{transform_indices = @transform_0, window_bounds = array<i64: 1, 18, 18, 4>}, {pipeline_mode = #tpu.pipeline_mode<synchronous>, transform_indices = @transform_1, window_bounds = array<i64: 9, 4, 128>}, {transform_indices = @transform_2, window_bounds = array<i64: 1, 8, 16, 128>}, {transform_indices = @transform_3, window_bounds = array<i64: 1, 1, 8, 128>}, {transform_indices = @transform_4, window_bounds = array<i64: 1, 1, 8, 128>}]} {
    %c8_i32 = arith.constant 8 : i32
    %0 = arith.muli %arg1, %c8_i32 : i32
    %1 = tpu.assume_multiple %0, 8 : i32
    %cst = arith.constant 0.000000e+00 : f32
    %2 = vector.broadcast %cst : f32 to vector<128x128xf32>
    %c0_i32 = arith.constant 0 : i32
    %3 = arith.addi %1, %c0_i32 : i32
    %c0 = arith.constant 0 : index
    %4 = arith.index_cast %3 : i32 to index
    %c0_0 = arith.constant 0 : index
    %c0_1 = arith.constant 0 : index
    %5 = vector.load %arg2[%c0, %4, %c0_0, %c0_1] : memref<1x18x18x4xbf16, #tpu.memory_space<vmem>>, vector<1x8x16x4xbf16>
    %6 = vector.shape_cast %5 : vector<1x8x16x4xbf16> to vector<8x16x4xbf16>
    %7 = vector.shape_cast %6 : vector<8x16x4xbf16> to vector<128x4xbf16>
    %c0_2 = arith.constant 0 : index
    %c0_3 = arith.constant 0 : index
    %c0_4 = arith.constant 0 : index
    %8 = vector.load %arg3[%c0_2, %c0_3, %c0_4] : memref<9x4x128xbf16, #tpu.memory_space<vmem>>, vector<1x4x128xbf16>
    %9 = vector.shape_cast %8 : vector<1x4x128xbf16> to vector<4x128xbf16>
    %cst_5 = arith.constant dense<0.000000e+00> : vector<128x128xf32>
    %10 = tpu.matmul %7, %9, %cst_5 {dimension_numbers = #tpu.dot_dimension_numbers<[1], [0], [0], [1], [0, 0, 1, 1], [], []>} : vector<128x4xbf16>, vector<4x128xbf16>, vector<128x128xf32> -> vector<128x128xf32>
    %11 = arith.addf %2, %10 : vector<128x128xf32>
    %c0_i32_6 = arith.constant 0 : i32
    %12 = arith.addi %1, %c0_i32_6 : i32
    %c0_7 = arith.constant 0 : index
    %13 = arith.index_cast %12 : i32 to index
    %c1 = arith.constant 1 : index
    %c0_8 = arith.constant 0 : index
    %14 = vector.load %arg2[%c0_7, %13, %c1, %c0_8] : memref<1x18x18x4xbf16, #tpu.memory_space<vmem>>, vector<1x8x16x4xbf16>
    %15 = vector.shape_cast %14 : vector<1x8x16x4xbf16> to vector<8x16x4xbf16>
    %16 = vector.shape_cast %15 : vector<8x16x4xbf16> to vector<128x4xbf16>
    %c1_9 = arith.constant 1 : index
    %c0_10 = arith.constant 0 : index
    %c0_11 = arith.constant 0 : index
    %17 = vector.load %arg3[%c1_9, %c0_10, %c0_11] : memref<9x4x128xbf16, #tpu.memory_space<vmem>>, vector<1x4x128xbf16>
    %18 = vector.shape_cast %17 : vector<1x4x128xbf16> to vector<4x128xbf16>
    %cst_12 = arith.constant dense<0.000000e+00> : vector<128x128xf32>
    %19 = tpu.matmul %16, %18, %cst_12 {dimension_numbers = #tpu.dot_dimension_numbers<[1], [0], [0], [1], [0, 0, 1, 1], [], []>} : vector<128x4xbf16>, vector<4x128xbf16>, vector<128x128xf32> -> vector<128x128xf32>
    %20 = arith.addf %11, %19 : vector<128x128xf32>
    %c0_i32_13 = arith.constant 0 : i32
    %21 = arith.addi %1, %c0_i32_13 : i32
    %c0_14 = arith.constant 0 : index
    %22 = arith.index_cast %21 : i32 to index
    %c2 = arith.constant 2 : index
    %c0_15 = arith.constant 0 : index
    %23 = vector.load %arg2[%c0_14, %22, %c2, %c0_15] : memref<1x18x18x4xbf16, #tpu.memory_space<vmem>>, vector<1x8x16x4xbf16>
    %24 = vector.shape_cast %23 : vector<1x8x16x4xbf16> to vector<8x16x4xbf16>
    %25 = vector.shape_cast %24 : vector<8x16x4xbf16> to vector<128x4xbf16>
    %c2_16 = arith.constant 2 : index
    %c0_17 = arith.constant 0 : index
    %c0_18 = arith.constant 0 : index
    %26 = vector.load %arg3[%c2_16, %c0_17, %c0_18] : memref<9x4x128xbf16, #tpu.memory_space<vmem>>, vector<1x4x128xbf16>
    %27 = vector.shape_cast %26 : vector<1x4x128xbf16> to vector<4x128xbf16>
    %cst_19 = arith.constant dense<0.000000e+00> : vector<128x128xf32>
    %28 = tpu.matmul %25, %27, %cst_19 {dimension_numbers = #tpu.dot_dimension_numbers<[1], [0], [0], [1], [0, 0, 1, 1], [], []>} : vector<128x4xbf16>, vector<4x128xbf16>, vector<128x128xf32> -> vector<128x128xf32>
    %29 = arith.addf %20, %28 : vector<128x128xf32>
    %c1_i32 = arith.constant 1 : i32
    %30 = arith.addi %1, %c1_i32 : i32
    %c0_20 = arith.constant 0 : index
    %31 = arith.index_cast %30 : i32 to index
    %c0_21 = arith.constant 0 : index
    %c0_22 = arith.constant 0 : index
    %32 = vector.load %arg2[%c0_20, %31, %c0_21, %c0_22] : memref<1x18x18x4xbf16, #tpu.memory_space<vmem>>, vector<1x8x16x4xbf16>
    %33 = vector.shape_cast %32 : vector<1x8x16x4xbf16> to vector<8x16x4xbf16>
    %34 = vector.shape_cast %33 : vector<8x16x4xbf16> to vector<128x4xbf16>
    %c3 = arith.constant 3 : index
    %c0_23 = arith.constant 0 : index
    %c0_24 = arith.constant 0 : index
    %35 = vector.load %arg3[%c3, %c0_23, %c0_24] : memref<9x4x128xbf16, #tpu.memory_space<vmem>>, vector<1x4x128xbf16>
    %36 = vector.shape_cast %35 : vector<1x4x128xbf16> to vector<4x128xbf16>
    %cst_25 = arith.constant dense<0.000000e+00> : vector<128x128xf32>
    %37 = tpu.matmul %34, %36, %cst_25 {dimension_numbers = #tpu.dot_dimension_numbers<[1], [0], [0], [1], [0, 0, 1, 1], [], []>} : vector<128x4xbf16>, vector<4x128xbf16>, vector<128x128xf32> -> vector<128x128xf32>
    %38 = arith.addf %29, %37 : vector<128x128xf32>
    %c1_i32_26 = arith.constant 1 : i32
    %39 = arith.addi %1, %c1_i32_26 : i32
    %c0_27 = arith.constant 0 : index
    %40 = arith.index_cast %39 : i32 to index
    %c1_28 = arith.constant 1 : index
    %c0_29 = arith.constant 0 : index
    %41 = vector.load %arg2[%c0_27, %40, %c1_28, %c0_29] : memref<1x18x18x4xbf16, #tpu.memory_space<vmem>>, vector<1x8x16x4xbf16>
    %42 = vector.shape_cast %41 : vector<1x8x16x4xbf16> to vector<8x16x4xbf16>
    %43 = vector.shape_cast %42 : vector<8x16x4xbf16> to vector<128x4xbf16>
    %c4 = arith.constant 4 : index
    %c0_30 = arith.constant 0 : index
    %c0_31 = arith.constant 0 : index
    %44 = vector.load %arg3[%c4, %c0_30, %c0_31] : memref<9x4x128xbf16, #tpu.memory_space<vmem>>, vector<1x4x128xbf16>
    %45 = vector.shape_cast %44 : vector<1x4x128xbf16> to vector<4x128xbf16>
    %cst_32 = arith.constant dense<0.000000e+00> : vector<128x128xf32>
    %46 = tpu.matmul %43, %45, %cst_32 {dimension_numbers = #tpu.dot_dimension_numbers<[1], [0], [0], [1], [0, 0, 1, 1], [], []>} : vector<128x4xbf16>, vector<4x128xbf16>, vector<128x128xf32> -> vector<128x128xf32>
    %47 = arith.addf %38, %46 : vector<128x128xf32>
    %c1_i32_33 = arith.constant 1 : i32
    %48 = arith.addi %1, %c1_i32_33 : i32
    %c0_34 = arith.constant 0 : index
    %49 = arith.index_cast %48 : i32 to index
    %c2_35 = arith.constant 2 : index
    %c0_36 = arith.constant 0 : index
    %50 = vector.load %arg2[%c0_34, %49, %c2_35, %c0_36] : memref<1x18x18x4xbf16, #tpu.memory_space<vmem>>, vector<1x8x16x4xbf16>
    %51 = vector.shape_cast %50 : vector<1x8x16x4xbf16> to vector<8x16x4xbf16>
    %52 = vector.shape_cast %51 : vector<8x16x4xbf16> to vector<128x4xbf16>
    %c5 = arith.constant 5 : index
    %c0_37 = arith.constant 0 : index
    %c0_38 = arith.constant 0 : index
    %53 = vector.load %arg3[%c5, %c0_37, %c0_38] : memref<9x4x128xbf16, #tpu.memory_space<vmem>>, vector<1x4x128xbf16>
    %54 = vector.shape_cast %53 : vector<1x4x128xbf16> to vector<4x128xbf16>
    %cst_39 = arith.constant dense<0.000000e+00> : vector<128x128xf32>
    %55 = tpu.matmul %52, %54, %cst_39 {dimension_numbers = #tpu.dot_dimension_numbers<[1], [0], [0], [1], [0, 0, 1, 1], [], []>} : vector<128x4xbf16>, vector<4x128xbf16>, vector<128x128xf32> -> vector<128x128xf32>
    %56 = arith.addf %47, %55 : vector<128x128xf32>
    %c2_i32 = arith.constant 2 : i32
    %57 = arith.addi %1, %c2_i32 : i32
    %c0_40 = arith.constant 0 : index
    %58 = arith.index_cast %57 : i32 to index
    %c0_41 = arith.constant 0 : index
    %c0_42 = arith.constant 0 : index
    %59 = vector.load %arg2[%c0_40, %58, %c0_41, %c0_42] : memref<1x18x18x4xbf16, #tpu.memory_space<vmem>>, vector<1x8x16x4xbf16>
    %60 = vector.shape_cast %59 : vector<1x8x16x4xbf16> to vector<8x16x4xbf16>
    %61 = vector.shape_cast %60 : vector<8x16x4xbf16> to vector<128x4xbf16>
    %c6 = arith.constant 6 : index
    %c0_43 = arith.constant 0 : index
    %c0_44 = arith.constant 0 : index
    %62 = vector.load %arg3[%c6, %c0_43, %c0_44] : memref<9x4x128xbf16, #tpu.memory_space<vmem>>, vector<1x4x128xbf16>
    %63 = vector.shape_cast %62 : vector<1x4x128xbf16> to vector<4x128xbf16>
    %cst_45 = arith.constant dense<0.000000e+00> : vector<128x128xf32>
    %64 = tpu.matmul %61, %63, %cst_45 {dimension_numbers = #tpu.dot_dimension_numbers<[1], [0], [0], [1], [0, 0, 1, 1], [], []>} : vector<128x4xbf16>, vector<4x128xbf16>, vector<128x128xf32> -> vector<128x128xf32>
    %65 = arith.addf %56, %64 : vector<128x128xf32>
    %c2_i32_46 = arith.constant 2 : i32
    %66 = arith.addi %1, %c2_i32_46 : i32
    %c0_47 = arith.constant 0 : index
    %67 = arith.index_cast %66 : i32 to index
    %c1_48 = arith.constant 1 : index
    %c0_49 = arith.constant 0 : index
    %68 = vector.load %arg2[%c0_47, %67, %c1_48, %c0_49] : memref<1x18x18x4xbf16, #tpu.memory_space<vmem>>, vector<1x8x16x4xbf16>
    %69 = vector.shape_cast %68 : vector<1x8x16x4xbf16> to vector<8x16x4xbf16>
    %70 = vector.shape_cast %69 : vector<8x16x4xbf16> to vector<128x4xbf16>
    %c7 = arith.constant 7 : index
    %c0_50 = arith.constant 0 : index
    %c0_51 = arith.constant 0 : index
    %71 = vector.load %arg3[%c7, %c0_50, %c0_51] : memref<9x4x128xbf16, #tpu.memory_space<vmem>>, vector<1x4x128xbf16>
    %72 = vector.shape_cast %71 : vector<1x4x128xbf16> to vector<4x128xbf16>
    %cst_52 = arith.constant dense<0.000000e+00> : vector<128x128xf32>
    %73 = tpu.matmul %70, %72, %cst_52 {dimension_numbers = #tpu.dot_dimension_numbers<[1], [0], [0], [1], [0, 0, 1, 1], [], []>} : vector<128x4xbf16>, vector<4x128xbf16>, vector<128x128xf32> -> vector<128x128xf32>
    %74 = arith.addf %65, %73 : vector<128x128xf32>
    %c2_i32_53 = arith.constant 2 : i32
    %75 = arith.addi %1, %c2_i32_53 : i32
    %c0_54 = arith.constant 0 : index
    %76 = arith.index_cast %75 : i32 to index
    %c2_55 = arith.constant 2 : index
    %c0_56 = arith.constant 0 : index
    %77 = vector.load %arg2[%c0_54, %76, %c2_55, %c0_56] : memref<1x18x18x4xbf16, #tpu.memory_space<vmem>>, vector<1x8x16x4xbf16>
    %78 = vector.shape_cast %77 : vector<1x8x16x4xbf16> to vector<8x16x4xbf16>
    %79 = vector.shape_cast %78 : vector<8x16x4xbf16> to vector<128x4xbf16>
    %c8 = arith.constant 8 : index
    %c0_57 = arith.constant 0 : index
    %c0_58 = arith.constant 0 : index
    %80 = vector.load %arg3[%c8, %c0_57, %c0_58] : memref<9x4x128xbf16, #tpu.memory_space<vmem>>, vector<1x4x128xbf16>
    %81 = vector.shape_cast %80 : vector<1x4x128xbf16> to vector<4x128xbf16>
    %cst_59 = arith.constant dense<0.000000e+00> : vector<128x128xf32>
    %82 = tpu.matmul %79, %81, %cst_59 {dimension_numbers = #tpu.dot_dimension_numbers<[1], [0], [0], [1], [0, 0, 1, 1], [], []>} : vector<128x4xbf16>, vector<4x128xbf16>, vector<128x128xf32> -> vector<128x128xf32>
    %83 = arith.addf %74, %82 : vector<128x128xf32>
    %84 = vector.shape_cast %83 : vector<128x128xf32> to vector<1x8x16x128xf32>
    %85 = arith.truncf %84 : vector<1x8x16x128xf32> to vector<1x8x16x128xbf16>
    %c0_60 = arith.constant 0 : index
    %c0_61 = arith.constant 0 : index
    %c0_62 = arith.constant 0 : index
    %c0_63 = arith.constant 0 : index
    %86 = vector.load %arg4[%c0_60, %c0_61, %c0_62, %c0_63] : memref<1x8x16x128xbf16, #tpu.memory_space<vmem>>, vector<1x8x16x128xbf16>
    tpu.vector_store %arg4[%c0_60, %c0_61, %c0_62, %c0_63], %85 {strides = array<i32>} : memref<1x8x16x128xbf16, #tpu.memory_space<vmem>>, vector<1x8x16x128xbf16>,
    %cst_64 = arith.constant dense<0.000000e+00> : vector<128xf32>
    %87 = vector.multi_reduction <add>, %83, %cst_64 [0] : vector<128x128xf32> to vector<128xf32>
    %88 = vector.shape_cast %87 : vector<128xf32> to vector<1x128xf32>
    %89 = arith.mulf %83, %83 : vector<128x128xf32>
    %cst_65 = arith.constant dense<0.000000e+00> : vector<128xf32>
    %90 = vector.multi_reduction <add>, %89, %cst_65 [0] : vector<128x128xf32> to vector<128xf32>
    %91 = vector.shape_cast %90 : vector<128xf32> to vector<1x128xf32>
    %92 = vector.shape_cast %88 : vector<1x128xf32> to vector<1x1x1x128xf32>
    %93 = vector.shape_cast %92 : vector<1x1x1x128xf32> to vector<1x1x1x128xf32>
    %94 = vector.broadcast %93 : vector<1x1x1x128xf32> to vector<1x1x8x128xf32>
    %c0_66 = arith.constant 0 : index
    %c0_67 = arith.constant 0 : index
    %c0_68 = arith.constant 0 : index
    %c0_69 = arith.constant 0 : index
    %95 = vector.load %arg5[%c0_66, %c0_67, %c0_68, %c0_69] : memref<1x1x8x128xf32, #tpu.memory_space<vmem>>, vector<1x1x8x128xf32>
    tpu.vector_store %arg5[%c0_66, %c0_67, %c0_68, %c0_69], %94 {strides = array<i32>} : memref<1x1x8x128xf32, #tpu.memory_space<vmem>>, vector<1x1x8x128xf32>,
    %96 = vector.shape_cast %91 : vector<1x128xf32> to vector<1x1x1x128xf32>
    %97 = vector.shape_cast %96 : vector<1x1x1x128xf32> to vector<1x1x1x128xf32>
    %98 = vector.broadcast %97 : vector<1x1x1x128xf32> to vector<1x1x8x128xf32>
    %c0_70 = arith.constant 0 : index
    %c0_71 = arith.constant 0 : index
    %c0_72 = arith.constant 0 : index
    %c0_73 = arith.constant 0 : index
    %99 = vector.load %arg6[%c0_70, %c0_71, %c0_72, %c0_73] : memref<1x1x8x128xf32, #tpu.memory_space<vmem>>, vector<1x1x8x128xf32>
    tpu.vector_store %arg6[%c0_70, %c0_71, %c0_72, %c0_73], %98 {strides = array<i32>} : memref<1x1x8x128xf32, #tpu.memory_space<vmem>>, vector<1x1x8x128xf32>,
    return
  }
  func.func @transform_0(%arg0: i32, %arg1: i32) -> (i32, i32, i32, i32) {
    %c0_i32 = arith.constant 0 : i32
    %c0_i32_0 = arith.constant 0 : i32
    %c0_i32_1 = arith.constant 0 : i32
    %c0_i32_2 = arith.constant 0 : i32
    return %arg0, %c0_i32, %c0_i32_0, %c0_i32_1 : i32, i32, i32, i32
  }
  func.func @transform_1(%arg0: i32, %arg1: i32) -> (i32, i32, i32) {
    %c0_i32 = arith.constant 0 : i32
    %c0_i32_0 = arith.constant 0 : i32
    %c0_i32_1 = arith.constant 0 : i32
    %c0_i32_2 = arith.constant 0 : i32
    return %c0_i32, %c0_i32_0, %c0_i32_1 : i32, i32, i32
  }
  func.func @transform_2(%arg0: i32, %arg1: i32) -> (i32, i32, i32, i32) {
    %c0_i32 = arith.constant 0 : i32
    %c0_i32_0 = arith.constant 0 : i32
    %c0_i32_1 = arith.constant 0 : i32
    return %arg0, %arg1, %c0_i32, %c0_i32_0 : i32, i32, i32, i32
  }
  func.func @transform_3(%arg0: i32, %arg1: i32) -> (i32, i32, i32, i32) {
    %c0_i32 = arith.constant 0 : i32
    %c0_i32_0 = arith.constant 0 : i32
    %c0_i32_1 = arith.constant 0 : i32
    return %arg0, %arg1, %c0_i32, %c0_i32_0 : i32, i32, i32, i32
  }
  func.func @transform_4(%arg0: i32, %arg1: i32) -> (i32, i32, i32, i32) {
    %c0_i32 = arith.constant 0 : i32
    %c0_i32_0 = arith.constant 0 : i32
    %c0_i32_1 = arith.constant 0 : i32
    return %arg0, %arg1, %c0_i32, %c0_i32_0 : i32, i32, i32, i32
  }
}

</mosaic_0001>

<bundles_post_ra>
// kernel: tpu_custom_call.1
= control target key start
LH: loop header
LB: loop body
LE: loop exit
PB: predicated region body
PF: predicated region fallthrough
CT: control target
= control target key end

     0   :  { %10 = vsyncpa [#allocation3], 0  ;;  %s5195_s0 = inlined_call_operand.vmem [shape: bf16[2,18,18,4], index: 0, kind: input, shape index: {}]   ;;  %s5196_s1 = inlined_call_operand.vmem [shape: bf16[9,4,128], index: 1, kind: input, shape index: {}]   ;;  %s5197_s2 = inlined_call_operand.hbm [shape: bf16[2,16,16,128], index: 2, kind: output, shape index: {0}]   ;;  %s5198_s3 = inlined_call_operand.hbm [shape: f32[2,2,8,128], index: 3, kind: output, shape index: {1}]   ;;  %s5199_s4 = inlined_call_operand.hbm [shape: f32[2,2,8,128], index: 4, kind: output, shape index: {2}]  }
   0x1   :  { %12 = vsyncpa [#allocation3 + $0x1], 0 }
   0x2   :  { %13 = vsyncpa [#allocation5], 0 }
   0x3   :  { %15 = vsyncpa [#allocation5 + $0x1], 0  ;;  %s4107_s15 = smov 0   ;;  %s4109_s16 = smov 0  }
   0x4   :  { %s4111_s17 = smov 0   ;;  %s4113_s18 = smov 0  }
   0x5   :  { %s4115_s19 = smov 0   ;;  %s4117_s20 = smov 0  }
   0x6   :  { %s4119_s21 = smov 0   ;;  %s4121_s22 = smov 0  }
   0x7 LB: > { %s3047_s23 = sadd.s32 4294967295, %s4075_s22   ;;  %s5205_s24 = sadd.s32 4294967294, %s4075_s22   ;;  %s4075_s22 = sphi %s4121_s22, %s21_s22   ;;  %s4071_s21 = sphi %s4119_s21, %s5232_s21   ;;  %s4067_s20 = sphi %s4117_s20, %s5231_s20   ;;  %s4063_s19 = sphi %s4115_s19, %s5230_s19   ;;  %s4059_s18 = sphi %s4113_s18, %s5229_s18   ;;  %s4055_s17 = sphi %s4111_s17, %s5228_s17   ;;  %s4051_s16 = sphi %s4109_s16, %s5227_s16   ;;  %s4047_s15 = sphi %s4107_s15, %s5226_s15  }
   0x8   : > { %s30_s25 = sadd.s32 1, %s4067_s20  ;;  %s33_s26 = sadd.s32 1, %s4071_s21 }
   0x9   : > { %p31_p0 = scmp.ge.s32.totalorder %s30_s25, 2  ;;  %p99_p1 = scmp.ne.s32.totalorder %s4055_s17, %s4051_s16 }
   0xa   : > { %p100_p2 = scmp.eq.s32.totalorder %s3047_s23, 3  ;;  %p105_p5 = scmp.ne.s32.totalorder %s4051_s16, %s4047_s15 }
   0xb   : > { %s5234_s25 = smov (%p31_p0, %s30_s25), 0  ;;  %s5236_s26 = smov (!%p31_p0, %s33_s26), %s4071_s21 }
   0xc   : > { %s85_s27 = ssub.s32 %s4067_s20, %s5234_s25  ;;  %p4160_p3 = por %p100_p2, %p99_p1 }
   0xd   : > { %p35_p4 = scmp.ge.s32.totalorder %s5236_s26, 2  ;;  %p106_p6 = scmp.eq.s32.totalorder %s5205_s24, 3 }
   0xe   : > { %p3051_p7 = scmp.ge.s32.totalorder %s4075_s22, 1  ;;  %p191_p9 = scmp.lt.s32.totalorder %s4075_s22, 5 }
   0xf   : > { %s5238_s26 = smov (%p35_p4, %s5236_s26), 0  ;;  %p4171_p8 = por %p106_p6, %p105_p5 }
  0x10   : > { %s84_s30 = ssub.s32 %s4071_s21, %s5238_s26  ;;  %s89_s5 = sadd.s32 1, %s4055_s17 }
  0x11   : > { %s86_s6 = sor.u32 %s85_s27, %s84_s30  ;;  %p192_p10 = pnand %p3051_p7, %p191_p9 }
  0x12   : > { %p87_p11 = scmp.eq.s32.totalorder %s86_s6, 0 }
  0x13   : > { %195 = sbr.rel (%p192_p10) target bundleno = 494 (0x1ee), region = 28 }
  0x14   : > { %s4180_s7 = scalar_select %p87_p11, %s4055_s17, %s89_s5  }
  0x1a   : > { %v3059_v0 = vld [vmem:[%s5196_s1 + $0x2] sm:$0x3]  ;;  %vm509_vm0 = vcmask 1041408   ;;  %v3176_v1 = vld [vmem:[%s5196_s1 + $0x8] sm:$0x3]  ;;  %p227_p12 = scmp.lt.s32.totalorder %s4063_s19, 1 }
  0x1b   : > { %3802 = vmatprep.subr.msk.bf16.mxu1 %vm509_vm0, %v3059_v0  ;;  %3806 = vmatprep.subr.msk.bf16.mxu0 %vm509_vm0, %v3176_v1  ;;  %v511_v2 = vsel %vm509_vm0, %v3059_v0, 0  ;;  %v4193_v3 = vsel %vm509_vm0, %v3176_v1, 0  ;;  %v254_v4 = vld [vmem:[%s5196_s1] sm:$0x3]  ;;  %s3364_s27 = smul.u32 96, %s4059_s18  ;;  %vm484_vm3 = vcmask 31744  }
  0x1c   : > { %3511 = vmatpush3.bf16.msra.mxu1 %v511_v2  ;;  %3583 = vmatpush3.bf16.msra.mxu0 %v4193_v3  ;;  %s228_s12 = scalar_select %p227_p12, %s4063_s19, 1  ;;  %v3209_v5 = vld [vmem:[%s5196_s1 + $0xa] sm:$0x3]  ;;  %vm263_vm1 = vsmask.f32 3328  ;;  %v4233_v17 = vsel %vm509_vm0, %v254_v4, 0 }
  0x1d   : > { %3803 = vmatprep.subr.msk.bf16.mxu1 %vm509_vm0, %v254_v4  ;;  %3808 = vmatprep.subr.msk.bf16.mxu0 %vm509_vm0, %v3209_v5  ;;  %vm264_vm2 = vsmask.f32 7440  ;;  %v4239_v26 = vld [vmem:[%s5196_s1 + $0xc] sm:$0x3]  ;;  %v4256_v37 = vsel %vm509_vm0, %v3209_v5, 0  ;;  %vm798_vm5 = vcmask 1042432  }
  0x1e   : > { %s3812_s6 = smul.u32 216, %s228_s12  ;;  %vm4248_vm4 = vmor %vm263_vm1, %vm264_vm2  ;;  %v4260_v41 = vsel %vm509_vm0, %v4239_v26, 0  ;;  %vm799_vm6 = vcmask 1046532   ;;  %s3381_s30 = sshll.u32 %s4059_s18, 4 }
  0x1f   : > { %vm4403_vm7 = vmor %vm798_vm5, %vm799_vm6  ;;  %s3356_s5 = sshll.u32 %s4063_s19, 5 }
  0x20   : > { %s231_s10 = scalar_lea.vmem %s5195_s0, %s3812_s6  ;;  %s2863_s6 = sadd.s32 %s3381_s30, %s3356_s5 }
  0x21   : > { %s4209_s11 = scalar_lea.vmem %s231_s10, %s3364_s27  ;;  %s3357_s8 = sshll.u32 %s2863_s6, 6 }
  0x22   : > { %v4212_v6 = vld [vmem:[%s4209_s11] sm:$0xf]  ;;  %v4215_v7 = vld [vmem:[%s4209_s11 + $0x4] sm:$0xf]  ;;  %v4218_v8 = vld [vmem:[%s4209_s11 + $0x8] sm:$0x1]  ;;  %s5063_s13 = scalar_lea.hbm %s5197_s2, %s3357_s8 }
  0x23   : > { %v267_v9 = vshrl.u32 %v4212_v6, 16  ;;  %v270_v10 = vshll.u32 %v4212_v6, 16  ;;  %v276_v11 = vshll.u32 %v4215_v7, 16  ;;  %v280_v12 = vshrl.u32 %v4215_v7, 16  ;;  %v3152_v13 = vld [vmem:[%s4209_s11 + $0xc] sm:$0xf] }
  0x24   : > { %v286_v14 = vshll.u32 %v4218_v8, 16  ;;  %v4227_v15 = vld [vmem:[%s4209_s11 + $0x10] sm:$0xf]  ;;  %v4230_v16 = vld [vmem:[%s4209_s11 + $0x14] sm:$0x1]  ;;  %v1250_v23 = vshrl.u32 %v3152_v13, 16 }
  0x25   : > { %v269_v18 = vrot.slane %v267_v9, 4  ;;  %v272_v19 = vrot.slane %v270_v10, 5  ;;  %v278_v20 = vrot.slane %v276_v11, 5  ;;  %v282_v21 = vrot.slane %v280_v12, 4  ;;  %v4244_v31 = vld [vmem:[%s4209_s11 + $0xc] sm:$0xf] }
  0x26   : > { %v288_v22 = vrot.slane %v286_v14, 5  ;;  %v1253_v24 = vshll.u32 %v3152_v13, 16  ;;  %v1259_v25 = vshll.u32 %v4227_v15, 16  ;;  %v1263_v29 = vshrl.u32 %v4227_v15, 16  ;;  %v4253_v36 = vld [vmem:[%s4209_s11 + $0x10] sm:$0xf] }
  0x27   : > { %v273_v27 = vor.u32 %v272_v19, %v269_v18  ;;  %v283_v28 = vor.u32 %v282_v21, %v278_v20  ;;  %v1269_v30 = vshll.u32 %v4230_v16, 16  ;;  %v1252_v33 = vrot.slane %v1250_v23, 4  ;;  %v4263_v44 = vld [vmem:[%s4209_s11 + $0x14] sm:$0x1]  ;;  %v3155_v55 = vld [vmem:[%s4209_s11 + $0x18] sm:$0xf] }
  0x28   : > { %v1255_v34 = vrot.slane %v1253_v24, 5  ;;  %v1261_v35 = vrot.slane %v1259_v25, 5  ;;  %v1265_v40 = vrot.slane %v1263_v29, 4  ;;  %v291_v45 = vshrl.u32 %v4244_v31, 16  ;;  %v4276_v60 = vld [vmem:[%s4209_s11 + $0x1c] sm:$0xf] }
  0x29   : > { %v274_v38 = vrot.slane %v273_v27, 4  ;;  %v284_v39 = vrot.slane %v283_v28, 4  ;;  %v1271_v43 = vrot.slane %v1269_v30, 5  ;;  %v294_v46 = vshll.u32 %v4244_v31, 16  ;;  %v4284_v1 = vld [vmem:[%s4209_s11 + $0x20] sm:$0x1] }
  0x2a   : > { %v1256_v42 = vor.u32 %v1255_v34, %v1252_v33  ;;  %v1266_v49 = vor.u32 %v1265_v40, %v1261_v35  ;;  %v300_v50 = vshll.u32 %v4253_v36, 16  ;;  %v293_v53 = vrot.slane %v291_v45, 4  ;;  %v4292_v21 = vld [vmem:[%s4209_s11 + $0x18] sm:$0xf]  ;;  %v4299_v27 = vld [vmem:[%s4209_s11 + $0x1c] sm:$0xf] }
  0x2b   : > { %v279_v47 = vsel %vm4248_vm4, %v274_v38, %v278_v20  ;;  %v289_v48 = vsel %vm4248_vm4, %v284_v39, %v288_v22  ;;  %v296_v54 = vrot.slane %v294_v46, 5  ;;  %v304_v58 = vshrl.u32 %v4253_v36, 16  ;;  %v4307_v38 = vld [vmem:[%s4209_s11 + $0x20] sm:$0x1]  ;;  %s4077_s5 = smov [#allocation2]  }
  0x2c   : > { %v3060_v51 = vcombine.low %v279_v47, %v289_v48  ;;  %v1257_v52 = vrot.slane %v1256_v42, 4  ;;  %v1267_v56 = vrot.slane %v1266_v49, 4  ;;  %v302_v57 = vrot.slane %v300_v50, 5  ;;  %v3158_v47 = vld [vmem:[%s4209_s11 + $0x24] sm:$0xf]  ;;  %s3925_s6 = sshll.u32 %s4077_s5, 4  ;;  %s3926_s6 = int_to_ptr.vmem [resolvable:$false] %s3925_s6 }
  0x2d   : > { %v310_v59 = vshll.u32 %v4263_v44, 16  ;;  %v1641_v62 = vrot.slane %v4227_v15, 5  ;;  %v1644_v63 = vrot.slane %v4230_v16, 5  ;;  %v297_v0 = vor.u32 %v296_v54, %v293_v53  ;;  %s3927_s8 = scalar_lea.vmem %s3926_s6, 2048 }
  0x2e   : > { %3512 = vmatprep.mubr.msk.bf16.mxu1 %vm484_vm3, %v3060_v51  ;;  %v1262_v61 = vsel %vm4248_vm4, %v1257_v52, %v1261_v35  ;;  %v1272_v2 = vsel %vm4248_vm4, %v1267_v56, %v1271_v43  ;;  %v306_v4 = vrot.slane %v304_v58, 4  ;;  %v1274_v9 = vshrl.u32 %v3155_v55, 16  ;;  %v4317_v52 = vld [vmem:[%s4209_s11 + $0x28] sm:$0xf] }
  0x2f   : > { %v312_v5 = vrot.slane %v310_v59, 5  ;;  %v3177_v10 = vcombine.low %v1262_v61, %v1272_v2  ;;  %v298_v11 = vrot.slane %v297_v0, 4  ;;  %v1277_v12 = vshll.u32 %v3155_v55, 16  ;;  %v4329_v61 = vld [vmem:[%s4209_s11 + $0x2c] sm:$0x1] }
  0x30   : > { %v1283_v13 = vshll.u32 %v4276_v60, 16  ;;  %v307_v14 = vor.u32 %v306_v4, %v302_v57  ;;  %v1276_v18 = vrot.slane %v1274_v9, 4  ;;  %v1287_v19 = vshrl.u32 %v4276_v60, 16 }
  0x31   : > { %v1293_v20 = vshll.u32 %v4284_v1, 16  ;;  %3584 = vmatprep.mubr.msk.bf16.mxu0 %vm484_vm3, %v3177_v10  ;;  %v303_v22 = vsel %vm4248_vm4, %v298_v11, %v302_v57  ;;  %v1279_v23 = vrot.slane %v1277_v12, 5  ;;  %v1648_v25 = vrot.slane %v4276_v60, 5  ;;  %v4323_v57 = vld [vmem:[%s5196_s1 + $0x4] sm:$0x3] }
  0x32   : > { %v1285_v24 = vrot.slane %v1283_v13, 5  ;;  %v308_v28 = vrot.slane %v307_v14, 4  ;;  %v1289_v29 = vrot.slane %v1287_v19, 4  ;;  %v1651_v33 = vrot.slane %v4284_v1, 5  ;;  %v4336_v11 = vld [vmem:[%s4209_s11 + $0x24] sm:$0xf] }
  0x33   : > { %v1295_v30 = vrot.slane %v1293_v20, 5  ;;  %v1280_v34 = vor.u32 %v1279_v23, %v1276_v18  ;;  %v4304_v35 = vrot.slane %v1648_v25, 4  ;;  %v315_v39 = vshrl.u32 %v4292_v21, 16  ;;  %v4339_v19 = vld [vmem:[%s4209_s11 + $0x28] sm:$0xf] }
  0x34   : > { %v318_v40 = vshll.u32 %v4292_v21, 16  ;;  %v313_v42 = vsel %vm4248_vm4, %v308_v28, %v312_v5  ;;  %v1290_v43 = vor.u32 %v1289_v29, %v1285_v24  ;;  %v324_v45 = vshll.u32 %v4299_v27, 16  ;;  %v4349_v29 = vld [vmem:[%s4209_s11 + $0x2c] sm:$0x1] }
  0x35   : > { %v328_v46 = vshrl.u32 %v4299_v27, 16  ;;  %v3061_v48 = vcombine.low %v303_v22, %v313_v42  ;;  %v1281_v49 = vrot.slane %v1280_v34, 4  ;;  %v317_v50 = vrot.slane %v315_v39, 4 }
  0x36   : > { %v320_v51 = vrot.slane %v318_v40, 5  ;;  %v1291_v53 = vrot.slane %v1290_v43, 4  ;;  %v326_v54 = vrot.slane %v324_v45, 5  ;;  %v334_v56 = vshll.u32 %v4307_v38, 16  ;;  %v3161_v45 = vld [vmem:[%s4209_s11 + $0x30] sm:$0xf] }
  0x37   : > { %v330_v55 = vrot.slane %v328_v46, 4  ;;  %3513 = vmatmul.mubr.msk.bf16.vlgmr.msra.gmra.mrb[0].mxu1 %vm484_vm3, %v3061_v48  ;;  %v1286_v58 = vsel %vm4248_vm4, %v1281_v49, %v1285_v24  ;;  %v1298_v0 = vshrl.u32 %v3158_v47, 16  ;;  %v1301_v2 = vshll.u32 %v3158_v47, 16 }
  0x38   : > { %v321_v59 = vor.u32 %v320_v51, %v317_v50  ;;  %3529 = vmatpush3.bf16.msra.mxu1 %v4233_v17  ;;  %v1296_v4 = vsel %vm4248_vm4, %v1291_v53, %v1295_v30  ;;  %v336_v9 = vrot.slane %v334_v56, 5  ;;  %v1307_v10 = vshll.u32 %v4317_v52, 16  ;;  %v4359_v50 = vld [vmem:[%s4209_s11 + $0x34] sm:$0xf] }
  0x39   : > { %v331_v5 = vor.u32 %v330_v55, %v326_v54  ;;  %v3178_v12 = vcombine.low %v1286_v58, %v1296_v4  ;;  %v1300_v14 = vrot.slane %v1298_v0, 4  ;;  %v1303_v18 = vrot.slane %v1301_v2, 5  ;;  %3804 = vmatprep.subr.msk.bf16.mxu1 %vm509_vm0, %v4323_v57  ;;  %v4369_v58 = vld [vmem:[%s4209_s11 + $0x38] sm:$0x1] }
  0x3a   : > { %v322_v13 = vrot.slane %v321_v59, 4  ;;  %v1309_v20 = vrot.slane %v1307_v10, 5  ;;  %v1311_v22 = vshrl.u32 %v4317_v52, 16  ;;  %v1317_v23 = vshll.u32 %v4329_v61, 16 }
  0x3b   : > { %v332_v17 = vrot.slane %v331_v5, 4  ;;  %3585 = vmatmul.mubr.msk.bf16.vlgmr.msra.gmra.mrb[0].mxu0 %vm484_vm3, %v3178_v12  ;;  %v1304_v28 = vor.u32 %v1303_v18, %v1300_v14  ;;  %v339_v30 = vshrl.u32 %v4336_v11, 16  ;;  %v342_v34 = vshll.u32 %v4336_v11, 16  ;;  %v4374_v14 = vld [vmem:[%s4209_s11 + $0x30] sm:$0xf] }
  0x3c   : > { %v327_v24 = vsel %vm4248_vm4, %v322_v13, %v326_v54  ;;  %3601 = vmatpush3.bf16.msra.mxu0 %v4256_v37  ;;  %v1313_v40 = vrot.slane %v1311_v22, 4  ;;  %v1319_v42 = vrot.slane %v1317_v23, 5  ;;  %v348_v43 = vshll.u32 %v4339_v19, 16  ;;  %v4380_v23 = vld [vmem:[%s4209_s11 + $0x34] sm:$0xf] }
  0x3d   : > { %v337_v39 = vsel %vm4248_vm4, %v332_v17, %v336_v9  ;;  %v1305_v47 = vrot.slane %v1304_v28, 4  ;;  %v341_v48 = vrot.slane %v339_v30, 4  ;;  %v344_v49 = vrot.slane %v342_v34, 5  ;;  %3809 = vmatprep.subr.msk.bf16.mxu0 %vm509_vm0, %v4239_v26 }
  0x3e   : > { %v3062_v46 = vcombine.low %v327_v24, %v337_v39  ;;  %v1314_v37 = vor.u32 %v1313_v40, %v1309_v20  ;;  %v350_v51 = vrot.slane %v348_v43, 5  ;;  %v352_v53 = vshrl.u32 %v4339_v19, 16  ;;  %v4385_v39 = vld [vmem:[%s4209_s11 + $0x38] sm:$0x1] }
  0x3f   : > { %v358_v54 = vshll.u32 %v4349_v29, 16  ;;  %v1310_v55 = vsel %vm4248_vm4, %v1305_v47, %v1309_v20  ;;  %v345_v56 = vor.u32 %v344_v49, %v341_v48  ;;  %v1322_v59 = vshrl.u32 %v3161_v45, 16 }
  0x40   : > { %3516 = vmatprep.mubr.msk.bf16.mxu1 %vm484_vm3, %v3062_v46  ;;  %v1325_v0 = vshll.u32 %v3161_v45, 16  ;;  %v1315_v2 = vrot.slane %v1314_v37, 4  ;;  %v354_v26 = vrot.slane %v352_v53, 4  ;;  %v1331_v5 = vshll.u32 %v4359_v50, 16  ;;  %v3193_v37 = vld [vmem:[%s4209_s11 + $0xc] sm:$0xe] }
  0x41   : > { %v360_v4 = vrot.slane %v358_v54, 5  ;;  %v346_v9 = vrot.slane %v345_v56, 4  ;;  %v1324_v10 = vrot.slane %v1322_v59, 4  ;;  %v1335_v13 = vshrl.u32 %v4359_v50, 16  ;;  %v4397_v56 = vld [vmem:[%s4209_s11 + $0x3c] sm:$0xf] }
  0x42   : > { %v1327_v12 = vrot.slane %v1325_v0, 5  ;;  %v1320_v18 = vsel %vm4248_vm4, %v1315_v2, %v1319_v42  ;;  %v355_v17 = vor.u32 %v354_v26, %v350_v51  ;;  %v1333_v20 = vrot.slane %v1331_v5, 5 }
  0x43   : > { %v1341_v22 = vshll.u32 %v4369_v58, 16  ;;  %v3179_v24 = vcombine.low %v1310_v55, %v1320_v18  ;;  %v351_v28 = vsel %vm4248_vm4, %v346_v9, %v350_v51  ;;  %v1337_v34 = vrot.slane %v1335_v13, 4  ;;  %v4411_v18 = vld [vmem:[%s4209_s11 + $0x44] sm:$0x1] }
  0x44   : > { %v1328_v30 = vor.u32 %v1327_v12, %v1324_v10  ;;  %v356_v40 = vrot.slane %v355_v17, 4  ;;  %v363_v42 = vshrl.u32 %v4374_v14, 16  ;;  %v366_v45 = vshll.u32 %v4374_v14, 16  ;;  %v3194_v17 = vld [vmem:[%s4209_s11 + $0x18] sm:$0xe] }
  0x45   : > { %v1343_v43 = vrot.slane %v1341_v22, 5  ;;  %3588 = vmatprep.mubr.msk.bf16.mxu0 %vm484_vm3, %v3179_v24  ;;  %v1338_v47 = vor.u32 %v1337_v34, %v1333_v20  ;;  %v372_v48 = vshll.u32 %v4380_v23, 16  ;;  %v376_v49 = vshrl.u32 %v4380_v23, 16 }
  0x46   : > { %v1329_v46 = vrot.slane %v1328_v30, 4  ;;  %v361_v51 = vsel %vm4248_vm4, %v356_v40, %v360_v4  ;;  %v365_v53 = vrot.slane %v363_v42, 4  ;;  %v368_v54 = vrot.slane %v366_v45, 5  ;;  %v4408_v4 = vld [vmem:[%s4209_s11 + $0x40] sm:$0xf] }
  0x47   : > { %v382_v55 = vshll.u32 %v4385_v39, 16  ;;  %v3063_v59 = vcombine.low %v351_v28, %v361_v51  ;;  %v1339_v2 = vrot.slane %v1338_v47, 4  ;;  %v374_v26 = vrot.slane %v372_v48, 5  ;;  %v4422_v30 = vld [vmem:[%s4209_s11 + $0x48] sm:$0xf] }
  0x48   : > { %v1334_v0 = vsel %vm4248_vm4, %v1329_v46, %v1333_v20  ;;  %v369_v9 = vor.u32 %v368_v54, %v365_v53  ;;  %v378_v10 = vrot.slane %v376_v49, 4  ;;  %v3201_v13 = vrot.slane %v3193_v37, 9 }
  0x49   : > { %v384_v12 = vrot.slane %v382_v55, 5  ;;  %3517 = vmatmul.mubr.msk.bf16.gmra.mrb[4].mxu1 %vm484_vm3, %v3063_v59  ;;  %v1344_v20 = vsel %vm4248_vm4, %v1339_v2, %v1343_v43  ;;  %v1643_v22 = vrot.slane %v1641_v62, 4  ;;  %v387_v24 = vshrl.u32 %v4397_v56, 16  ;;  %v4442_v55 = vld [vmem:[%s4209_s11 + $0x50] sm:$0x1] }
  0x4a   : > { %v390_v28 = vshll.u32 %v4397_v56, 16  ;;  %v3180_v34 = vcombine.low %v1334_v0, %v1344_v20  ;;  %v370_v40 = vrot.slane %v369_v9, 4  ;;  %v379_v42 = vor.u32 %v378_v10, %v374_v26 }
  0x4b   : > { %v1642_v45 = vsel %vm4403_vm7, %v3201_v13, %v1641_v62  ;;  %v1645_v43 = vsel %vm4403_vm7, %v1643_v22, %v1644_v63  ;;  %v389_v46 = vrot.slane %v387_v24, 4  ;;  %v396_v48 = vshll.u32 %v4408_v4, 16  ;;  %v4438_v62 = vld [vmem:[%s4209_s11 + $0x4c] sm:$0xf] }
  0x4c   : > { %v392_v47 = vrot.slane %v390_v28, 5  ;;  %3589 = vmatmul.mubr.msk.bf16.gmra.mrb[4].mxu0 %vm484_vm3, %v3180_v34  ;;  %v375_v49 = vsel %vm4248_vm4, %v370_v40, %v374_v26  ;;  %v380_v37 = vrot.slane %v379_v42, 4  ;;  %v3210_v15 = vcombine.low %v1642_v45, %v1645_v43  ;;  %v4460_v28 = vld [vmem:[%s4209_s11 + $0x54] sm:$0xf]  ;;  %v4471_v34 = vld [vmem:[%s5196_s1 + $0xe] sm:$0x3] }
  0x4d   : > { %v400_v51 = vshrl.u32 %v4408_v4, 16  ;;  %v398_v53 = vrot.slane %v396_v48, 5  ;;  %v406_v63 = vshll.u32 %v4411_v18, 16  ;;  %v3202_v54 = vrot.slane %v3194_v17, 9 }
  0x4e   : > { %v393_v16 = vor.u32 %v392_v47, %v389_v46  ;;  %v385_v59 = vsel %vm4248_vm4, %v380_v37, %v384_v12  ;;  %3602 = vmatprep.mubr.msk.bf16.mxu0 %vm484_vm3, %v3210_v15  ;;  %v1652_v2 = vsel %vm4403_vm7, %v4304_v35, %v1651_v33  ;;  %v411_v26 = vshrl.u32 %v4422_v30, 16  ;;  %v3195_v12 = vld [vmem:[%s4209_s11 + $0x24] sm:$0xe]  ;;  %v4476_v37 = vld [vmem:[%s4209_s11 + $0x58] sm:$0xf] }
  0x4f   : > { %v402_v0 = vrot.slane %v400_v51, 4  ;;  %v3064_v9 = vcombine.low %v375_v49, %v385_v59  ;;  %v408_v13 = vrot.slane %v406_v63, 5  ;;  %v1649_v17 = vsel %vm4403_vm7, %v3202_v54, %v1648_v25  ;;  %v4485_v54 = vld [vmem:[%s4209_s11 + $0x5c] sm:$0x1] }
  0x50   : > { %v394_v10 = vrot.slane %v393_v16, 4  ;;  %v3211_v22 = vcombine.low %v1649_v17, %v1652_v2  ;;  %v413_v24 = vrot.slane %v411_v26, 4  ;;  %v414_v1 = vshll.u32 %v4422_v30, 16 }
  0x51   : > { %v403_v20 = vor.u32 %v402_v0, %v398_v53  ;;  %3520 = vmatprep.mubr.msk.bf16.mxu1 %vm484_vm3, %v3064_v9  ;;  %v420_v35 = vshll.u32 %v4438_v62, 16  ;;  %v424_v60 = vshrl.u32 %v4438_v62, 16  ;;  %v430_v25 = vshll.u32 %v4442_v55, 16 }
  0x52   : > { %v399_v33 = vsel %vm4248_vm4, %v394_v10, %v398_v53  ;;  %v416_v42 = vrot.slane %v414_v1, 5  ;;  %v3203_v45 = vrot.slane %v3195_v12, 9  ;;  %v1655_v43 = vrot.slane %v4317_v52, 5  ;;  %v3196_v10 = vld [vmem:[%s4209_s11 + $0x30] sm:$0xe] }
  0x53   : > { %v404_v40 = vrot.slane %v403_v20, 4  ;;  %v422_v46 = vrot.slane %v420_v35, 5  ;;  %v426_v47 = vrot.slane %v424_v60, 4  ;;  %v432_v48 = vrot.slane %v430_v25, 5 }
  0x54   : > { %v1658_v49 = vrot.slane %v4329_v61, 5  ;;  %3603 = vmatmul.mubr.msk.bf16.vlgmr.msra.gmra.mrb[0].mxu0 %vm484_vm3, %v3211_v22  ;;  %v417_v51 = vor.u32 %v416_v42, %v413_v24  ;;  %v1656_v16 = vsel %vm4403_vm7, %v3203_v45, %v1655_v43  ;;  %v1657_v53 = vrot.slane %v1655_v43, 4  ;;  %v4506_v42 = vld [vmem:[%s4209_s11 + $0x40] sm:$0xf]  ;;  %v4509_v45 = vld [vmem:[%s4209_s11 + $0x44] sm:$0x1] }
  0x55   : > { %v409_v15 = vsel %vm4248_vm4, %v404_v40, %v408_v13  ;;  %3619 = vmatpush3.bf16.msra.mxu0 %v4260_v41  ;;  %v427_v52 = vor.u32 %v426_v47, %v422_v46  ;;  %v435_v61 = vshrl.u32 %v4460_v28, 16  ;;  %v438_v59 = vshll.u32 %v4460_v28, 16 }
  0x56   : > { %v3065_v63 = vcombine.low %v399_v33, %v409_v15  ;;  %v418_v0 = vrot.slane %v417_v51, 4  ;;  %v1659_v2 = vsel %vm4403_vm7, %v1657_v53, %v1658_v49  ;;  %v444_v26 = vshll.u32 %v4476_v37, 16  ;;  %3810 = vmatprep.subr.msk.bf16.mxu0 %vm509_vm0, %v4471_v34  ;;  %v3197_v33 = vld [vmem:[%s4209_s11 + $0x3c] sm:$0xe] }
  0x57   : > { %v448_v9 = vshrl.u32 %v4476_v37, 16  ;;  %v428_v41 = vrot.slane %v427_v52, 4  ;;  %v3212_v13 = vcombine.low %v1656_v16, %v1659_v2  ;;  %v437_v17 = vrot.slane %v435_v61, 4  ;;  %v3198_v2 = vld [vmem:[%s4209_s11 + $0x48] sm:$0xe] }
  0x58   : > { %3521 = vmatmul.mubr.msk.bf16.gmra.mrb[8].mxu1 %vm484_vm3, %v3065_v63  ;;  %v440_v12 = vrot.slane %v438_v59, 5  ;;  %v423_v20 = vsel %vm4248_vm4, %v418_v0, %v422_v46  ;;  %v446_v22 = vrot.slane %v444_v26, 5  ;;  %v454_v1 = vshll.u32 %v4485_v54, 16  ;;  %v4524_v59 = vld [vmem:[%s4209_s11 + $0x4c] sm:$0xf] }
  0x59   : > { %v450_v24 = vrot.slane %v448_v9, 4  ;;  %v433_v35 = vsel %vm4248_vm4, %v428_v41, %v432_v48  ;;  %3606 = vmatprep.mubr.msk.bf16.mxu0 %vm484_vm3, %v3212_v13  ;;  %v3204_v25 = vrot.slane %v3196_v10, 9  ;;  %v1662_v40 = vrot.slane %v4359_v50, 5  ;;  %v4527_v0 = vld [vmem:[%s4209_s11 + $0x50] sm:$0x1] }
  0x5a   : > { %v441_v60 = vor.u32 %v440_v12, %v437_v17  ;;  %v3066_v43 = vcombine.low %v423_v20, %v433_v35  ;;  %v456_v47 = vrot.slane %v454_v1, 5  ;;  %v1665_v49 = vrot.slane %v4369_v58, 5  ;;  %v4535_v17 = vld [vmem:[%s4209_s11 + $0x58] sm:$0xf]  ;;  %v4538_v12 = vld [vmem:[%s4209_s11 + $0x5c] sm:$0x1] }
  0x5b   : > { %v451_v46 = vor.u32 %v450_v24, %v446_v22  ;;  %v1663_v48 = vsel %vm4403_vm7, %v3204_v25, %v1662_v40  ;;  %v1664_v51 = vrot.slane %v1662_v40, 4  ;;  %v3205_v16 = vrot.slane %v3197_v33, 9  ;;  %5212 = vst [vmem:[#allocation9_spill] sm:$0xff] %v4538_v12  ;;  %v4548_v35 = vld [vmem:[%s4209_s11 + $0x64] sm:$0xf] }
  0x5c   : > { %v442_v15 = vrot.slane %v441_v60, 4  ;;  %3524 = vmatprep.mubr.msk.bf16.mxu1 %vm484_vm3, %v3066_v43  ;;  %v1669_v53 = vrot.slane %v4506_v42, 5  ;;  %v1672_v63 = vrot.slane %v4509_v45, 5  ;;  %v3076_v61 = vcombine.low %v4212_v6, %v4215_v7  ;;  %v3199_v6 = vld [vmem:[%s4209_s11 + $0x54] sm:$0xe]  ;;  %5213 = vst [vmem:[#allocation10_spill] sm:$0xff] %v4548_v35 }
  0x5d   : > { %v452_v50 = vrot.slane %v451_v46, 4  ;;  %v1666_v58 = vsel %vm4403_vm7, %v1664_v51, %v1665_v49  ;;  %v1676_v24 = vrot.slane %v4524_v59, 5  ;;  %v1679_v1 = vrot.slane %v4527_v0, 5  ;;  %v4551_v60 = vld [vmem:[%s4209_s11 + $0x68] sm:$0x1] }
  0x5e   : > { %v447_v52 = vsel %vm4248_vm4, %v442_v15, %v446_v22  ;;  %v3213_v9 = vcombine.low %v1663_v48, %v1666_v58  ;;  %v1670_v10 = vsel %vm4403_vm7, %v3205_v16, %v1669_v53  ;;  %v1671_v41 = vrot.slane %v1669_v53, 4  ;;  %5214 = vst [vmem:[#allocation11_spill] sm:$0xff] %v4551_v60 }
  0x5f   : > { %v457_v26 = vsel %vm4248_vm4, %v452_v50, %v456_v47  ;;  %v3206_v22 = vrot.slane %v3198_v2, 9  ;;  %v1678_v40 = vrot.slane %v1676_v24, 4  ;;  %v3207_v43 = vrot.slane %v3199_v6, 9  ;;  %v3200_v47 = vld [vmem:[%s4209_s11 + $0x60] sm:$0xe] }
  0x60   : > { %v3067_v13 = vcombine.low %v447_v52, %v457_v26  ;;  %3607 = vmatmul.mubr.msk.bf16.gmra.mrb[4].mxu0 %vm484_vm3, %v3213_v9  ;;  %v1673_v20 = vsel %vm4403_vm7, %v1671_v41, %v1672_v63  ;;  %v1683_v46 = vrot.slane %v4535_v17, 5  ;;  %v810_v49 = vrot.slane %v4253_v36, 5  ;;  %v776_v2 = vld [vmem:[%s4209_s11 + $0x18] sm:$0xe]  ;;  %v4583_v6 = vld [vmem:[%s5196_s1 + $0x6] sm:$0x3] }
  0x61   : > { %v3214_v33 = vcombine.low %v1670_v10, %v1673_v20  ;;  %v1677_v25 = vsel %vm4403_vm7, %v3206_v22, %v1676_v24  ;;  %v1686_v15 = vrot.slane %v4538_v12, 5  ;;  %v1680_v48 = vsel %vm4403_vm7, %v1678_v40, %v1679_v1  ;;  %v778_v1 = vld [vmem:[%s4209_s11 + $0x30] sm:$0xe] }
  0x62   : > { %3525 = vmatmul.mubr.msk.bf16.gmra.mrb[12].mxu1 %vm484_vm3, %v3067_v13  ;;  %v1684_v51 = vsel %vm4403_vm7, %v3207_v43, %v1683_v46  ;;  %v1685_v16 = vrot.slane %v1683_v46, 4  ;;  %v1690_v50 = vrot.slane %v4548_v35, 5  ;;  %v3077_v53 = vcombine.low %v4244_v31, %v4253_v36  ;;  %v777_v36 = vld [vmem:[%s4209_s11 + $0x24] sm:$0xe]  ;;  %v4857_v12 = vld [vmem:[%s4209_s11 + $0x70] sm:$0xf] }
  0x63   : > { %3530 = vmatprep.mubr.msk.bf16.mxu1 %vm484_vm3, %v3076_v61  ;;  %3610 = vmatprep.mubr.msk.bf16.mxu0 %vm484_vm3, %v3214_v33  ;;  %v3215_v63 = vcombine.low %v1677_v25, %v1680_v48  ;;  %v3208_v52 = vrot.slane %v3200_v47, 9  ;;  %v1693_v58 = vrot.slane %v4551_v60, 5  ;;  %v775_v61 = vld [vmem:[%s4209_s11 + $0xc] sm:$0xe]  ;;  %v813_v26 = vrot.slane %v4263_v44, 5 }
  0x64   : > { %v3078_v9 = vcombine.low %v4292_v21, %v4299_v27  ;;  %v1687_v10 = vsel %vm4403_vm7, %v1685_v16, %v1686_v15  ;;  %v1692_v41 = vrot.slane %v1690_v50, 4  ;;  %v908_v13 = vsel %vm509_vm0, %v4323_v57, 0  ;;  %v3901_v16 = vld [vmem:[%s4209_s11 + $0x18] sm:$0xff]   ;;  %v4829_v60 = vld [vmem:[%s4209_s11 + $0x64] sm:$0xf] }
  0x65   : > { %v3216_v31 = vcombine.low %v1684_v51, %v1687_v10  ;;  %v3093_v44 = vrot.slane %v775_v61, 9  ;;  %v812_v20 = vrot.slane %v810_v49, 4  ;;  %v3094_v21 = vrot.slane %v776_v2, 9  ;;  %5215 = vst [vmem:[#allocation12_spill] sm:$0xff] %v4829_v60 }
  0x66   : > { %v1691_v22 = vsel %vm4403_vm7, %v3208_v52, %v1690_v50  ;;  %v1694_v57 = vsel %vm4403_vm7, %v1692_v41, %v1693_v58  ;;  %v817_v24 = vrot.slane %v4299_v27, 5  ;;  %v820_v40 = vrot.slane %v4307_v38, 5 }
  0x67   : > { %v4596_v33 = vsel %vm4403_vm7, %v3093_v44, %v810_v49  ;;  %v4600_v25 = vsel %vm4403_vm7, %v812_v20, %v813_v26  ;;  %v3095_v43 = vrot.slane %v777_v36, 9  ;;  %v3217_v49 = vcombine.low %v1691_v22, %v1694_v57  ;;  %v3261_v26 = vld [vmem:[%s4209_s11 + $0x18] sm:$0xf]  ;;  %v3903_v57 = vld [vmem:[%s4209_s11 + $0x24] sm:$0xff]  }
  0x68   : > { %3611 = vmatmul.mubr.msk.bf16.gmra.mrb[8].mxu0 %vm484_vm3, %v3215_v63  ;;  %v3102_v27 = vcombine.low %v4596_v33, %v4600_v25  ;;  %v4609_v46 = vsel %vm4403_vm7, %v3094_v21, %v817_v24  ;;  %v819_v47 = vrot.slane %v817_v24, 4  ;;  %v824_v15 = vrot.slane %v4339_v19, 5 }
  0x69   : > { %3614 = vmatprep.mubr.msk.bf16.mxu0 %vm484_vm3, %v3216_v31  ;;  %v827_v48 = vrot.slane %v4349_v29, 5  ;;  %v3096_v38 = vrot.slane %v778_v1, 9  ;;  %v3079_v51 = vcombine.low %v4336_v11, %v4339_v19  ;;  %v834_v63 = vrot.slane %v4385_v39, 5  ;;  %v779_v19 = vld [vmem:[%s4209_s11 + $0x3c] sm:$0xe] }
  0x6a   : > { %3531 = vmatmul.mubr.msk.bf16.vlgmr.msra.gmra.mrb[0].mxu1 %vm484_vm3, %v3077_v53  ;;  %v4618_v50 = vsel %vm4403_vm7, %v819_v47, %v820_v40  ;;  %v831_v53 = vrot.slane %v4380_v23, 5  ;;  %v3080_v52 = vcombine.low %v4374_v14, %v4380_v23  ;;  %v4628_v58 = vsel %vm4403_vm7, %v3095_v43, %v824_v15  ;;  %v774_v14 = vld [vmem:[%s4209_s11] sm:$0xe]  ;;  %v4656_v31 = vld [vmem:[%s4209_s11 + $0x1c] sm:$0xf] }
  0x6b   : > { %3547 = vmatpush3.bf16.msra.mxu1 %v908_v13  ;;  %3534 = vmatprep.mubr.msk.bf16.mxu1 %vm484_vm3, %v3078_v9  ;;  %v3103_v29 = vcombine.low %v4609_v46, %v4618_v50  ;;  %v826_v11 = vrot.slane %v824_v15, 4  ;;  %v803_v61 = vrot.slane %v4215_v7, 5  ;;  %v3097_v10 = vrot.slane %v779_v19, 9  ;;  %v780_v1 = vld [vmem:[%s4209_s11 + $0x48] sm:$0xe] }
  0x6c   : > { %3805 = vmatprep.subr.msk.bf16.mxu1 %vm509_vm0, %v4583_v6  ;;  %v4634_v2 = vsel %vm4403_vm7, %v3096_v38, %v831_v53  ;;  %v833_v39 = vrot.slane %v831_v53, 4  ;;  %v806_v41 = vrot.slane %v4218_v8, 5  ;;  %v3092_v36 = vrot.slane %v774_v14, 9  ;;  %v4682_v38 = vld [vmem:[%s5196_s1 + $0x10] sm:$0x3] }
  0x6d   : > { %v4640_v23 = vsel %vm4403_vm7, %v826_v11, %v827_v48  ;;  %v805_v44 = vrot.slane %v803_v61, 4  ;;  %v838_v20 = vrot.slane %v4408_v4, 5  ;;  %v841_v21 = vrot.slane %v4411_v18, 5  ;;  %v4703_v14 = vld [vmem:[%s4209_s11 + $0x28] sm:$0xf] }
  0x6e   : > { %v4649_v9 = vsel %vm4403_vm7, %v833_v39, %v834_v63  ;;  %v3081_v22 = vcombine.low %v4397_v56, %v4408_v4  ;;  %v2088_v24 = vshrl.u32 %v3261_v26, 16  ;;  %v2091_v8 = vshll.u32 %v3261_v26, 16  ;;  %v3905_v4 = vld [vmem:[%s4209_s11 + $0x30] sm:$0xff]   ;;  %v4805_v46 = vld [vmem:[%s4209_s11 + $0x44] sm:$0x1] }
  0x6f   : > { %v2097_v40 = vshll.u32 %v4656_v31, 16  ;;  %v2101_v43 = vshrl.u32 %v4656_v31, 16  ;;  %v4668_v47 = vsel %vm4403_vm7, %v3097_v10, %v838_v20  ;;  %v2330_v18 = vsel %vm509_vm0, %v4471_v34, 0  ;;  %v3279_v7 = vld [vmem:[%s4209_s11 + $0x60] sm:$0xf] }
  0x70   : > { %3615 = vmatmul.mubr.msk.bf16.gmra.mrb[12].mxu0 %vm484_vm3, %v3217_v49  ;;  %v840_v49 = vrot.slane %v838_v20, 4  ;;  %v3082_v56 = vcombine.low %v4422_v30, %v4438_v62  ;;  %v804_v15 = vsel %vm4403_vm7, %v3092_v36, %v803_v61  ;;  %v807_v48 = vsel %vm4403_vm7, %v805_v44, %v806_v41  ;;  %v4690_v30 = vld [vmem:[%s4209_s11 + $0x20] sm:$0x1]  ;;  %v3264_v61 = vld [vmem:[%s4209_s11 + $0x24] sm:$0xf] }
  0x71   : > { %3620 = vmatprep.mubr.msk.bf16.mxu0 %vm484_vm3, %v3901_v16  ;;  %v3098_v34 = vrot.slane %v780_v1, 9  ;;  %v2090_v16 = vrot.slane %v2088_v24, 4  ;;  %v2093_v53 = vrot.slane %v2091_v8, 5  ;;  %v4696_v11 = vrot.slane %v2097_v40, 5  ;;  %v781_v44 = vld [vmem:[%s4209_s11 + $0x54] sm:$0xe] }
  0x72   : > { %3535 = vmatmul.mubr.msk.bf16.gmra.mrb[4].mxu1 %vm484_vm3, %v3079_v51  ;;  %v4686_v51 = vsel %vm4403_vm7, %v840_v49, %v841_v21  ;;  %v2103_v19 = vrot.slane %v2101_v43, 4  ;;  %v848_v39 = vrot.slane %v4442_v55, 5  ;;  %v3083_v10 = vcombine.low %v4460_v28, %v4476_v37  ;;  %v3267_v55 = vld [vmem:[%s4209_s11 + $0x30] sm:$0xf]  ;;  %v3907_v20 = vld [vmem:[%s4209_s11 + $0x3c] sm:$0xff]   ;;  %v3908_v1 = vld [vmem:[%s4209_s11 + $0x48] sm:$0xff]  }
  0x73   : > { %3538 = vmatprep.mubr.msk.bf16.mxu1 %vm484_vm3, %v3080_v52  ;;  %v845_v52 = vrot.slane %v4438_v62, 5  ;;  %v3101_v41 = vcombine.low %v804_v15, %v807_v48  ;;  %v2107_v36 = vshll.u32 %v4690_v30, 16  ;;  %v2094_v21 = vor.u32 %v2093_v53, %v2090_v16  ;;  %v4722_v8 = vld [vmem:[%s4209_s11 + $0x34] sm:$0xf] }
  0x74   : > { %v2104_v28 = vor.u32 %v2103_v19, %v4696_v11  ;;  %v2121_v40 = vshll.u32 %v4703_v14, 16  ;;  %v2125_v43 = vshrl.u32 %v4703_v14, 16  ;;  %v852_v15 = vrot.slane %v4476_v37, 5 }
  0x75   : > { %v4707_v62 = vsel %vm4403_vm7, %v3098_v34, %v845_v52  ;;  %v847_v26 = vrot.slane %v845_v52, 4  ;;  %v2145_v48 = vshll.u32 %v4722_v8, 16  ;;  %v2149_v34 = vshrl.u32 %v4722_v8, 16 }
  0x76   : > { %v855_v16 = vrot.slane %v4485_v54, 5  ;;  %v2095_v53 = vrot.slane %v2094_v21, 4  ;;  %v2109_v52 = vrot.slane %v2107_v36, 5  ;;  %v2105_v37 = vrot.slane %v2104_v28, 4  ;;  %v4745_v36 = vld [vmem:[%s4209_s11 + $0x2c] sm:$0x1] }
  0x77   : > { %v4719_v24 = vsel %vm4403_vm7, %v847_v26, %v848_v39  ;;  %v4741_v26 = vrot.slane %v2121_v40, 5  ;;  %v4752_v21 = vld [vmem:[%s4209_s11 + $0x38] sm:$0x1]  ;;  %v1110_v28 = vsel %vm509_vm0, %v4583_v6, 0 }
  0x78   : > { %3621 = vmatmul.mubr.msk.bf16.vlgmr.msra.gmra.mrb[0].mxu0 %vm484_vm3, %v3903_v57  ;;  %v2115_v57 = vshll.u32 %v3264_v61, 16  ;;  %v3909_v40 = vld [vmem:[%s4209_s11 + $0x54] sm:$0xff]  }
  0x79   : > { %3637 = vmatpush3.bf16.msra.mxu0 %v2330_v18  ;;  %3624 = vmatprep.mubr.msk.bf16.mxu0 %vm484_vm3, %v3905_v4  ;;  %v2136_v18 = vshrl.u32 %v3267_v55, 16  ;;  %v3099_v4 = vrot.slane %v781_v44, 9 }
  0x7a   : > { %3539 = vmatmul.mubr.msk.bf16.gmra.mrb[8].mxu1 %vm484_vm3, %v3081_v22  ;;  %3811 = vmatprep.subr.msk.bf16.mxu0 %vm509_vm0, %v4682_v38  ;;  %v2112_v22 = vshrl.u32 %v3264_v61, 16  ;;  %v854_v61 = vrot.slane %v852_v15, 4  ;;  %v2117_v54 = vrot.slane %v2115_v57, 5  ;;  %v2151_v57 = vrot.slane %v2149_v34, 4  ;;  %v3273_v34 = vld [vmem:[%s4209_s11 + $0x48] sm:$0xf] }
  0x7b   : > { %3542 = vmatprep.mubr.msk.bf16.mxu1 %vm484_vm3, %v3082_v56  ;;  %v2139_v56 = vshll.u32 %v3267_v55, 16  ;;  %v4737_v19 = vsel %vm4403_vm7, %v3099_v4, %v852_v15  ;;  %v2127_v55 = vrot.slane %v2125_v43, 4  ;;  %v2138_v44 = vrot.slane %v2136_v18, 4  ;;  %v4763_v43 = vld [vmem:[%s4209_s11 + $0x40] sm:$0xf] }
  0x7c   : > { %v2114_v39 = vrot.slane %v2112_v22, 4  ;;  %v4754_v22 = vrot.slane %v2145_v48, 5  ;;  %v3910_v18 = vld [vmem:[%s4209_s11 + $0x60] sm:$0xff]   ;;  %v2110_v4 = vsel %vm4248_vm4, %v2105_v37, %v2109_v52  ;;  %v2131_v48 = vshll.u32 %v4745_v36, 16 }
  0x7d   : > { %v2184_v52 = vshrl.u32 %v3273_v34, 16  ;;  %v2187_v37 = vshll.u32 %v3273_v34, 16 }
  0x7e   : > { %v2118_v15 = vor.u32 %v2117_v54, %v2114_v39  ;;  %v2152_v63 = vor.u32 %v2151_v57, %v4754_v22  ;;  %v3276_v57 = vld [vmem:[%s4209_s11 + $0x54] sm:$0xf] }
  0x7f   : > { %v2186_v50 = vrot.slane %v2184_v52, 4  ;;  %v2211_v34 = vshll.u32 %v3276_v57, 16 }
  0x80   : > { %3625 = vmatmul.mubr.msk.bf16.gmra.mrb[4].mxu0 %vm484_vm3, %v3907_v20  ;;  %v2141_v20 = vrot.slane %v2139_v56, 5  ;;  %v2100_v56 = vsel %vm4248_vm4, %v2095_v53, %v4696_v11  ;;  %v2169_v11 = vshll.u32 %v4763_v43, 16  ;;  %v2173_v53 = vshrl.u32 %v4763_v43, 16 }
  0x81   : > { %3628 = vmatprep.mubr.msk.bf16.mxu0 %vm484_vm3, %v3908_v1  ;;  %v2155_v1 = vshll.u32 %v4752_v21, 16  ;;  %v3286_v54 = vcombine.low %v2100_v56, %v2110_v4  ;;  %v2153_v56 = vrot.slane %v2152_v63, 4  ;;  %v4810_v63 = vld [vmem:[%s4209_s11 + $0x50] sm:$0x1] }
  0x82   : > { %3543 = vmatmul.mubr.msk.bf16.gmra.mrb[12].mxu1 %vm484_vm3, %v3083_v10  ;;  %v4749_v10 = vsel %vm4403_vm7, %v854_v61, %v855_v16  ;;  %v4774_v16 = vld [vmem:[%s4209_s11 + $0x4c] sm:$0xf]  ;;  %v2128_v61 = vor.u32 %v2127_v55, %v4741_v26  ;;  %v2142_v6 = vor.u32 %v2141_v20, %v2138_v44  ;;  %v2119_v55 = vrot.slane %v2118_v15, 4 }
  0x83   : > { %3548 = vmatprep.mubr.msk.bf16.mxu1 %vm484_vm3, %v3101_v41  ;;  %v3270_v41 = vld [vmem:[%s4209_s11 + $0x3c] sm:$0xf]  ;;  %v2193_v39 = vshll.u32 %v4774_v16, 16  ;;  %v2133_v44 = vrot.slane %v2131_v48, 5  ;;  %v2197_v20 = vshrl.u32 %v4774_v16, 16  ;;  %v2157_v33 = vrot.slane %v2155_v1, 5 }
  0x84   : > { %v2160_v49 = vshrl.u32 %v3270_v41, 16  ;;  %v2163_v13 = vshll.u32 %v3270_v41, 16  ;;  %v2129_v41 = vrot.slane %v2128_v61, 4  ;;  %v4798_v15 = vrot.slane %v2169_v11, 5 }
  0x85   : > { %v2175_v48 = vrot.slane %v2173_v53, 4  ;;  %v2208_v1 = vshrl.u32 %v3276_v57, 16  ;;  %v1379_v11 = vshll.u32 %v4524_v59, 16  ;;  %v2124_v53 = vsel %vm4248_vm4, %v2119_v55, %v4741_v26 }
  0x86   : > { %v2162_v25 = vrot.slane %v2160_v49, 4  ;;  %v2165_v4 = vrot.slane %v2163_v13, 5  ;;  %v4807_v49 = vrot.slane %v2193_v39, 5  ;;  %v2199_v13 = vrot.slane %v2197_v20, 4 }
  0x87   : > { %v2134_v52 = vsel %vm4248_vm4, %v2129_v41, %v2133_v44  ;;  %v2176_v57 = vor.u32 %v2175_v48, %v4798_v15  ;;  %v2158_v26 = vsel %vm4248_vm4, %v2153_v56, %v2157_v33  ;;  %v2210_v44 = vrot.slane %v2208_v1, 4  ;;  %v4848_v56 = vld [vmem:[%s4209_s11 + $0x5c] sm:$0x1] }
  0x88   : > { %3629 = vmatmul.mubr.msk.bf16.gmra.mrb[8].mxu0 %vm484_vm3, %v3909_v40  ;;  %v2143_v40 = vrot.slane %v2142_v6, 4  ;;  %v2166_v20 = vor.u32 %v2165_v4, %v2162_v25  ;;  %v2200_v41 = vor.u32 %v2199_v13, %v4807_v49  ;;  %v5217_v33 = vcombine.low %v4634_v2, %v4649_v9 }
  0x89   : > { %3632 = vmatprep.mubr.msk.bf16.mxu0 %vm484_vm3, %v3910_v18  ;;  %v3911_v18 = vld [vmem:[%s4209_s11 + $0x6c] sm:$0xff]   ;;  %v2232_v4 = vshrl.u32 %v3279_v7, 16  ;;  %v1383_v48 = vshrl.u32 %v4524_v59, 16  ;;  %v3287_v13 = vcombine.low %v2124_v53, %v2134_v52 }
  0x8a   : > { %3549 = vmatmul.mubr.msk.bf16.vlgmr.msra.gmra.mrb[0].mxu1 %vm484_vm3, %v3102_v27  ;;  %v4795_v27 = vld [vmem:[%s4209_s11 + $0x58] sm:$0xf]  ;;  %v2148_v39 = vsel %vm4248_vm4, %v2143_v40, %v4754_v22  ;;  %v5216_v22 = vcombine.low %v4628_v58, %v4640_v23  ;;  %v2213_v40 = vrot.slane %v2211_v34, 5  ;;  %v2235_v58 = vshll.u32 %v3279_v7, 16 }
  0x8b   : > { %3565 = vmatpush3.bf16.msra.mxu1 %v1110_v28  ;;  %3552 = vmatprep.mubr.msk.bf16.mxu1 %vm484_vm3, %v3103_v29  ;;  %v3920_v28 = vld [vmem:[%s5196_s1 + $0x8] sm:$0x3]  ;;  %v2189_v29 = vrot.slane %v2187_v37, 5  ;;  %v2217_v61 = vshll.u32 %v4795_v27, 16  ;;  %v2221_v6 = vshrl.u32 %v4795_v27, 16  ;;  %v2584_v37 = vsel %vm509_vm0, %v4682_v38, 0 }
  0x8c   : > { %3807 = vmatprep.subr.msk.bf16.mxu1 %vm509_vm0, %v3920_v28  ;;  %v2179_v28 = vshll.u32 %v4805_v46, 16  ;;  %v2203_v38 = vshll.u32 %v4810_v63, 16  ;;  %v2241_v23 = vshll.u32 %v4829_v60, 16  ;;  %v3288_v34 = vcombine.low %v2148_v39, %v2158_v26 }
  0x8d   : > { %v2190_v55 = vor.u32 %v2189_v29, %v2186_v50  ;;  %v4841_v25 = vrot.slane %v2217_v61, 5  ;;  %v2167_v50 = vrot.slane %v2166_v20, 4  ;;  %v2177_v29 = vrot.slane %v2176_v57, 4 }
  0x8e   : > { %v2181_v1 = vrot.slane %v2179_v28, 5  ;;  %v2205_v9 = vrot.slane %v2203_v38, 5  ;;  %v2201_v61 = vrot.slane %v2200_v41, 4  ;;  %v2227_v7 = vshll.u32 %v4848_v56, 16  ;;  %v4869_v28 = vld [vmem:[%s4209_s11 + $0x68] sm:$0x1] }
  0x8f   : > { %v2191_v2 = vrot.slane %v2190_v55, 4  ;;  %v2234_v35 = vrot.slane %v2232_v4, 4  ;;  %v4859_v59 = vrot.slane %v2241_v23, 5  ;;  %v4861_v57 = vrot.slane %v1379_v11, 5 }
  0x90   : > { %3633 = vmatmul.mubr.msk.bf16.gmra.mrb[12].mxu0 %vm484_vm3, %v3911_v18  ;;  %v2223_v18 = vrot.slane %v2221_v6, 4  ;;  %v2214_v6 = vor.u32 %v2213_v40, %v2210_v44  ;;  %v1385_v53 = vrot.slane %v1383_v48, 4  ;;  %v2172_v52 = vsel %vm4248_vm4, %v2167_v50, %v4798_v15 }
  0x91   : > { %3638 = vmatprep.mubr.msk.bf16.mxu0 %vm484_vm3, %v3286_v54  ;;  %v2245_v54 = vshrl.u32 %v4829_v60, 16  ;;  %v2237_v60 = vrot.slane %v2235_v58, 5  ;;  %v2182_v39 = vsel %vm4248_vm4, %v2177_v29, %v2181_v1  ;;  %v2265_v38 = vshll.u32 %v4857_v12, 16  ;;  %v3912_v1 = vld [vmem:[%s4209_s11 + $0xc] sm:$0xff]  }
  0x92   : > { %3553 = vmatmul.mubr.msk.bf16.gmra.mrb[4].mxu1 %vm484_vm3, %v5216_v22  ;;  %v2224_v22 = vor.u32 %v2223_v18, %v4841_v25  ;;  %v2269_v44 = vshrl.u32 %v4857_v12, 16  ;;  %v5218_v11 = vcombine.low %v4668_v47, %v4686_v51  ;;  %v2196_v15 = vsel %vm4248_vm4, %v2191_v2, %v4807_v49 }
  0x93   : > { %3556 = vmatprep.mubr.msk.bf16.mxu1 %vm484_vm3, %v5217_v33  ;;  %v3282_v33 = vld [vmem:[%s4209_s11 + $0x6c] sm:$0xf]  ;;  %v2247_v20 = vrot.slane %v2245_v54, 4  ;;  %v2206_v41 = vsel %vm4248_vm4, %v2201_v61, %v2205_v9  ;;  %v2215_v40 = vrot.slane %v2214_v6, 4  ;;  %v2229_v18 = vrot.slane %v2227_v7, 5 }
  0x94   : > { %v2256_v26 = vshrl.u32 %v3282_v33, 16  ;;  %v2259_v55 = vshll.u32 %v3282_v33, 16  ;;  %v5219_v4 = vcombine.low %v4707_v62, %v4719_v24  ;;  %v2225_v47 = vrot.slane %v2224_v22, 4  ;;  %v3167_v22 = vld [vmem:[%s4209_s11 + $0x48] sm:$0xf] }
  0x95   : > { %v2238_v51 = vor.u32 %v2237_v60, %v2234_v35  ;;  %v2251_v49 = vshll.u32 %v4869_v28, 16  ;;  %v1386_v58 = vor.u32 %v1385_v53, %v4861_v57  ;;  %v1389_v23 = vshll.u32 %v4527_v0, 16  ;;  %v4898_v60 = vld [vmem:[%s4209_s11 + $0x74] sm:$0x1] }
  0x96   : > { %v3289_v54 = vcombine.low %v2172_v52, %v2182_v39  ;;  %v2258_v48 = vrot.slane %v2256_v26, 4  ;;  %v2261_v62 = vrot.slane %v2259_v55, 5  ;;  %v4892_v24 = vrot.slane %v2265_v38, 5 }
  0x97   : > { %v2271_v50 = vrot.slane %v2269_v44, 4  ;;  %v3290_v29 = vcombine.low %v2196_v15, %v2206_v41  ;;  %v2220_v35 = vsel %vm4248_vm4, %v2215_v40, %v4841_v25  ;;  %v2239_v0 = vrot.slane %v2238_v51, 4  ;;  %v3914_v51 = vld [vmem:[%s4209_s11 + $0x24] sm:$0xff]  }
  0x98   : > { %3639 = vmatmul.mubr.msk.bf16.vlgmr.msra.gmra.mrb[0].mxu0 %vm484_vm3, %v3287_v13  ;;  %v2230_v13 = vsel %vm4248_vm4, %v2225_v47, %v2229_v18  ;;  %v2253_v2 = vrot.slane %v2251_v49, 5  ;;  %v1387_v9 = vrot.slane %v1386_v58, 4  ;;  %v1391_v61 = vrot.slane %v1389_v23, 5 }
  0x99   : > { %3655 = vmatpush3.bf16.msra.mxu0 %v2584_v37  ;;  %3642 = vmatprep.mubr.msk.bf16.mxu0 %vm484_vm3, %v3288_v34  ;;  %v2248_v37 = vor.u32 %v2247_v20, %v4859_v59  ;;  %v2479_v6 = vrot.slane %v4656_v31, 5  ;;  %v2262_v7 = vor.u32 %v2261_v62, %v2258_v48  ;;  %v2272_v33 = vor.u32 %v2271_v50, %v4892_v24  ;;  %v3302_v20 = vld [vmem:[%s4209_s11 + $0x18] sm:$0xe]  ;;  %v3304_v62 = vld [vmem:[%s4209_s11 + $0x30] sm:$0xe] }
  0x9a   : > { %3557 = vmatmul.mubr.msk.bf16.gmra.mrb[8].mxu1 %vm484_vm3, %v5218_v11  ;;  %v2275_v25 = vshll.u32 %v4898_v60, 16  ;;  %v5220_v53 = vcombine.low %v4737_v19, %v4749_v10  ;;  %v3291_v52 = vcombine.low %v2220_v35, %v2230_v13  ;;  %v2244_v31 = vsel %vm4248_vm4, %v2239_v0, %v4859_v59  ;;  %v3913_v59 = vld [vmem:[%s4209_s11 + $0x18] sm:$0xff]  }
  0x9b   : > { %3560 = vmatprep.mubr.msk.bf16.mxu1 %vm484_vm3, %v5219_v4  ;;  %v2249_v34 = vrot.slane %v2248_v37, 4  ;;  %v1370_v26 = vshrl.u32 %v3167_v22, 16  ;;  %v1373_v55 = vshll.u32 %v3167_v22, 16  ;;  %v3310_v19 = vrot.slane %v3302_v20, 9  ;;  %v3164_v4 = vld [vmem:[%s4209_s11 + $0x3c] sm:$0xf] }
  0x9c   : > { %v2481_v10 = vrot.slane %v2479_v6, 4  ;;  %v2482_v38 = vrot.slane %v4690_v30, 5  ;;  %v1392_v44 = vsel %vm4248_vm4, %v1387_v9, %v1391_v61  ;;  %v2263_v11 = vrot.slane %v2262_v7, 4  ;;  %v3303_v30 = vld [vmem:[%s4209_s11 + $0x24] sm:$0xe]  ;;  %v3915_v22 = vld [vmem:[%s4209_s11 + $0x30] sm:$0xff]  }
  0x9d   : > { %v2254_v39 = vsel %vm4248_vm4, %v2249_v34, %v2253_v2  ;;  %v2273_v15 = vrot.slane %v2272_v33, 4  ;;  %v2277_v41 = vrot.slane %v2275_v25, 5  ;;  %v1372_v40 = vrot.slane %v1370_v26, 4  ;;  %v3916_v20 = vld [vmem:[%s4209_s11 + $0x3c] sm:$0xff]   ;;  %v3170_v26 = vld [vmem:[%s4209_s11 + $0x54] sm:$0xf] }
  0x9e   : > { %v3292_v18 = vcombine.low %v2244_v31, %v2254_v39  ;;  %v1375_v47 = vrot.slane %v1373_v55, 5  ;;  %v2480_v37 = vsel %vm4403_vm7, %v3310_v19, %v2479_v6  ;;  %v2483_v49 = vsel %vm4403_vm7, %v2481_v10, %v2482_v38  ;;  %v3306_v38 = vld [vmem:[%s4209_s11 + $0x48] sm:$0xe] }
  0x9f   : > { %v2486_v58 = vrot.slane %v4703_v14, 5  ;;  %v2278_v48 = vsel %vm4248_vm4, %v2273_v15, %v2277_v41  ;;  %v2493_v50 = vrot.slane %v4722_v8, 5  ;;  %v1349_v35 = vshll.u32 %v3164_v4, 16 }
  0xa0   : > { %3643 = vmatmul.mubr.msk.bf16.gmra.mrb[4].mxu0 %vm484_vm3, %v3289_v54  ;;  %v1376_v23 = vor.u32 %v1375_v47, %v1372_v40  ;;  %v2268_v54 = vsel %vm4248_vm4, %v2263_v11, %v4892_v24  ;;  %v1355_v14 = vshll.u32 %v4506_v42, 16  ;;  %v3311_v24 = vrot.slane %v3303_v30, 9 }
  0xa1   : > { %3646 = vmatprep.mubr.msk.bf16.mxu0 %vm484_vm3, %v3290_v29  ;;  %v1346_v29 = vshrl.u32 %v3164_v4, 16  ;;  %v2489_v8 = vrot.slane %v4745_v36, 5  ;;  %v3319_v0 = vcombine.low %v2480_v37, %v2483_v49  ;;  %v2488_v34 = vrot.slane %v2486_v58, 4  ;;  %v3917_v37 = vld [vmem:[%s4209_s11 + $0x48] sm:$0xff]  }
  0xa2   : > { %3561 = vmatmul.mubr.msk.bf16.gmra.mrb[12].mxu1 %vm484_vm3, %v5220_v53  ;;  %v1377_v13 = vrot.slane %v1376_v23, 4  ;;  %v3312_v2 = vrot.slane %v3304_v62, 9  ;;  %v3293_v61 = vcombine.low %v2268_v54, %v2278_v48  ;;  %v2495_v6 = vrot.slane %v2493_v50, 4  ;;  %v3918_v23 = vld [vmem:[%s4209_s11 + $0x54] sm:$0xff]  }
  0xa3   : > { %3566 = vmatprep.mubr.msk.bf16.mxu1 %vm484_vm3, %v3912_v1  ;;  %v1359_v1 = vshrl.u32 %v4506_v42, 16  ;;  %v2496_v42 = vrot.slane %v4752_v21, 5  ;;  %v1348_v7 = vrot.slane %v1346_v29, 4  ;;  %v1351_v33 = vrot.slane %v1349_v35, 5 }
  0xa4   : > { %v1382_v9 = vsel %vm4248_vm4, %v1377_v13, %v4861_v57  ;;  %v4954_v25 = vrot.slane %v1355_v14, 5  ;;  %v2487_v53 = vsel %vm4403_vm7, %v3311_v24, %v2486_v58  ;;  %v2490_v57 = vsel %vm4403_vm7, %v2488_v34, %v2489_v8  ;;  %v3307_v24 = vld [vmem:[%s4209_s11 + $0x54] sm:$0xe]  ;;  %v5221_v8 = vld [vmem:[#allocation12_spill] sm:$0xff] }
  0xa5   : > { %v1361_v36 = vrot.slane %v1359_v1, 4  ;;  %v2494_v21 = vsel %vm4403_vm7, %v3312_v2, %v2493_v50  ;;  %v2500_v31 = vrot.slane %v4763_v43, 5  ;;  %v1365_v39 = vshll.u32 %v4509_v45, 16  ;;  %v3173_v50 = vld [vmem:[%s4209_s11 + $0x60] sm:$0xf] }
  0xa6   : > { %v2497_v55 = vsel %vm4403_vm7, %v2495_v6, %v2496_v42  ;;  %v1352_v19 = vor.u32 %v1351_v33, %v1348_v7  ;;  %v3320_v43 = vcombine.low %v2487_v53, %v2490_v57  ;;  %v2503_v11 = vrot.slane %v4805_v46, 5  ;;  %v5223_v33 = vld [vmem:[#allocation9_spill] sm:$0xff] }
  0xa7   : > { %v1362_v10 = vor.u32 %v1361_v36, %v4954_v25  ;;  %v1394_v15 = vshrl.u32 %v3170_v26, 16  ;;  %v1397_v41 = vshll.u32 %v3170_v26, 16  ;;  %v1403_v40 = vshll.u32 %v4535_v17, 16 }
  0xa8   : > { %3647 = vmatmul.mubr.msk.bf16.gmra.mrb[8].mxu0 %vm484_vm3, %v3291_v52  ;;  %v3305_v52 = vld [vmem:[%s4209_s11 + $0x3c] sm:$0xe]  ;;  %v2502_v4 = vrot.slane %v2500_v31, 4  ;;  %v1367_v47 = vrot.slane %v1365_v39, 5  ;;  %v2510_v58 = vrot.slane %v4810_v63, 5  ;;  %v2514_v63 = vrot.slane %v4795_v27, 5 }
  0xa9   : > { %3650 = vmatprep.mubr.msk.bf16.mxu0 %vm484_vm3, %v3292_v18  ;;  %v3313_v45 = vrot.slane %v3305_v52, 9  ;;  %v3321_v18 = vcombine.low %v2494_v21, %v2497_v55  ;;  %v1363_v49 = vrot.slane %v1362_v10, 4  ;;  %v1396_v46 = vrot.slane %v1394_v15, 4  ;;  %v3308_v27 = vld [vmem:[%s4209_s11 + $0x60] sm:$0xe] }
  0xaa   : > { %3567 = vmatmul.mubr.msk.bf16.vlgmr.msra.gmra.mrb[0].mxu1 %vm484_vm3, %v3913_v59  ;;  %v1407_v59 = vshrl.u32 %v4535_v17, 16  ;;  %v1399_v54 = vrot.slane %v1397_v41, 5  ;;  %v1405_v48 = vrot.slane %v1403_v40, 5  ;;  %v2504_v29 = vsel %vm4403_vm7, %v2502_v4, %v2503_v11  ;;  %v3919_v52 = vld [vmem:[%s4209_s11 + $0x60] sm:$0xff]  }
  0xab   : > { %3673 = vmatpush3.bf16.msra.mxu1 %v4193_v3  ;;  %3570 = vmatprep.mubr.msk.bf16.mxu1 %vm484_vm3, %v3914_v51  ;;  %v4951_v3 = vcombine.low %v1382_v9, %v1392_v44  ;;  %v2507_v44 = vrot.slane %v4774_v16, 5  ;;  %v3314_v51 = vrot.slane %v3306_v38, 9  ;;  %v1353_v16 = vrot.slane %v1352_v19, 4  ;;  %v5222_v9 = vld [vmem:[#allocation10_spill] sm:$0xff] }
  0xac   : > { %v1409_v62 = vrot.slane %v1407_v59, 4  ;;  %v2501_v17 = vsel %vm4403_vm7, %v3313_v45, %v2500_v31  ;;  %v1368_v1 = vsel %vm4248_vm4, %v1363_v49, %v1367_v47  ;;  %v1418_v34 = vshrl.u32 %v3173_v50, 16  ;;  %v3309_v47 = vld [vmem:[%s4209_s11 + $0x6c] sm:$0xe]  ;;  %s5046_s11 = sand.u32 1, %s4051_s16  }
  0xad   : > { %v2509_v30 = vrot.slane %v2507_v44, 4  ;;  %v2508_v35 = vsel %vm4403_vm7, %v3314_v51, %v2507_v44  ;;  %v1358_v14 = vsel %vm4248_vm4, %v1353_v16, %v4954_v25  ;;  %v1421_v2 = vshll.u32 %v3173_v50, 16  ;;  %s3052_s14 = sshll.u32 %s5046_s11, 6 }
  0xae   : > { %v1431_v6 = vshrl.u32 %v5222_v9, 16  ;;  %v3322_v42 = vcombine.low %v2501_v17, %v2504_v29  ;;  %v1410_v7 = vor.u32 %v1409_v62, %v1405_v48  ;;  %v1413_v25 = vshll.u32 %v5223_v33, 16  ;;  %s5049_s27 = scalar_lea.vmem [#allocation2], %s3052_s14  ;;  %s2840_s14 = scalar_lea.sflag [#allocation3], %s5046_s11 }
  0xaf   : > { %v2511_v13 = vsel %vm4403_vm7, %v2509_v30, %v2510_v58  ;;  %v2516_v53 = vrot.slane %v2514_v63, 4  ;;  %v2517_v57 = vrot.slane %v4848_v56, 5  ;;  %v3181_v21 = vcombine.low %v1358_v14, %v1368_v1  ;;  %s2866_s9 = sshll.u32 %s5049_s27, 4  ;;  %s5065_s9 = int_to_ptr.vmem [resolvable:$true] %s2866_s9 }
  0xb0   : > { %3651 = vmatmul.mubr.msk.bf16.gmra.mrb[12].mxu0 %vm484_vm3, %v3293_v61  ;;  %v1427_v61 = vshll.u32 %v5222_v9, 16  ;;  %v3323_v36 = vcombine.low %v2508_v35, %v2511_v13  ;;  %v3316_v31 = vrot.slane %v3308_v27, 9  ;;  %v2524_v26 = vrot.slane %v4869_v28, 5  ;;  %s3921_s30 = scalar_lea.vmem %s5065_s9, 1024  ;;  %p3928_p2 = scmp.lt.s32.totalorder %s5065_s9, %s3926_s6 }
  0xb1   : > { %3656 = vmatprep.mubr.msk.bf16.mxu0 %vm484_vm3, %v3319_v0  ;;  %v2521_v0 = vrot.slane %v5221_v8, 5  ;;  %v1420_v55 = vrot.slane %v1418_v34, 4  ;;  %v1423_v19 = vrot.slane %v1421_v2, 5  ;;  %v1433_v38 = vrot.slane %v1431_v6, 4  ;;  %p3922_p13 = scmp.ne.s32.totalorder %s5065_s9, %s3921_s30  ;;  %p3929_p4 = scmp.lt.s32.totalorder %s3927_s8, %s3921_s30 }
  0xb2   : > { %3571 = vmatmul.mubr.msk.bf16.gmra.mrb[4].mxu1 %vm484_vm3, %v3915_v22  ;;  %v1400_v22 = vor.u32 %v1399_v54, %v1396_v46  ;;  %v1429_v10 = vrot.slane %v1427_v61, 5  ;;  %v1415_v45 = vrot.slane %v1413_v25, 5  ;;  %v2518_v28 = vsel %vm4403_vm7, %v2516_v53, %v2517_v57 }
  0xb3   : > { %3574 = vmatprep.mubr.msk.bf16.mxu1 %vm484_vm3, %v3916_v20  ;;  %v3315_v20 = vrot.slane %v3307_v24, 9  ;;  %v2523_v39 = vrot.slane %v2521_v0, 4  ;;  %v2522_v11 = vsel %vm4403_vm7, %v3316_v31, %v2521_v0  ;;  %v2528_v15 = vrot.slane %v4857_v12, 5  ;;  %p3923_p0 = pnand %p3922_p13, %p4160_p3  ;;  %p3930_p5 = por %p3929_p4, %p3928_p2 }
  0xb4   : > { %v1401_v44 = vrot.slane %v1400_v22, 4  ;;  %v1424_v40 = vor.u32 %v1423_v19, %v1420_v55  ;;  %v1434_v59 = vor.u32 %v1433_v38, %v1429_v10  ;;  %v3317_v30 = vrot.slane %v3309_v47, 9 }
  0xb5   : > { %v2515_v56 = vsel %vm4403_vm7, %v3315_v20, %v2514_v63  ;;  %v2525_v41 = vsel %vm4403_vm7, %v2523_v39, %v2524_v26  ;;  %v2530_v12 = vrot.slane %v2528_v15, 4  ;;  %v2531_v58 = vrot.slane %v4898_v60, 5  ;;  %p3924_p1 = pneg %p3923_p0 }
  0xb6   : > { %v1406_v51 = vsel %vm4248_vm4, %v1401_v44, %v1405_v48  ;;  %v3324_v16 = vcombine.low %v2515_v56, %v2518_v28  ;;  %v3325_v49 = vcombine.low %v2522_v11, %v2525_v41  ;;  %v1425_v46 = vrot.slane %v1424_v40, 4 }
  0xb7   : > { %v1435_v54 = vrot.slane %v1434_v59, 4  ;;  %v2529_v48 = vsel %vm4403_vm7, %v3317_v30, %v2528_v15  ;;  %v2532_v50 = vsel %vm4403_vm7, %v2530_v12, %v2531_v58  ;;  %p3931_p6 = pnand %p3930_p5, %p3924_p1 }
  0xb8   : > { %3657 = vmatmul.mubr.msk.bf16.vlgmr.msra.gmra.mrb[0].mxu0 %vm484_vm3, %v3320_v43  ;;  %v1411_v43 = vrot.slane %v1410_v7, 4  ;;  %v1430_v60 = vsel %vm4248_vm4, %v1425_v46, %v1429_v10  ;;  %v3326_v29 = vcombine.low %v2529_v48, %v2532_v50 }
  0xb9   : > { %3660 = vmatprep.mubr.msk.bf16.mxu0 %vm484_vm3, %v3321_v18  ;;  %v5224_v18 = vld [vmem:[#allocation11_spill] sm:$0xff] }
  0xba   : > { %3575 = vmatmul.mubr.msk.bf16.gmra.mrb[8].mxu1 %vm484_vm3, %v3917_v37  ;;  %v1437_v4 = vshll.u32 %v5224_v18, 16  ;;  %v1416_v37 = vsel %vm4248_vm4, %v1411_v43, %v1415_v45 }
  0xbb   : > { %3578 = vmatprep.mubr.msk.bf16.mxu1 %vm484_vm3, %v3918_v23  ;;  %v3183_v23 = vcombine.low %v1406_v51, %v1416_v37 }
  0xbc   : > { %v1439_v62 = vrot.slane %v1437_v4, 5 }
  0xbe   : > { %v1440_v17 = vsel %vm4248_vm4, %v1435_v54, %v1439_v62 }
  0xbf   : > { %v3184_v35 = vcombine.low %v1430_v60, %v1440_v17 }
  0xc0   : > { %3661 = vmatmul.mubr.msk.bf16.gmra.mrb[4].mxu0 %vm484_vm3, %v3322_v42 }
  0xc1   : > { %3664 = vmatprep.mubr.msk.bf16.mxu0 %vm484_vm3, %v3323_v36 }
  0xc2   : > { %3579 = vmatmul.mubr.msk.bf16.gmra.mrb[12].mxu1 %vm484_vm3, %v3919_v52 }
  0xc3   : > { %3592 = vmatprep.mubr.msk.bf16.mxu1 %vm484_vm3, %v3181_v21 }
  0xc8   : > { %3665 = vmatmul.mubr.msk.bf16.gmra.mrb[8].mxu0 %vm484_vm3, %v3324_v16 }
  0xc9   : > { %3668 = vmatprep.mubr.msk.bf16.mxu0 %vm484_vm3, %v3325_v49 }
  0xca   : > { %3593 = vmatmul.mubr.msk.bf16.vlgmr.msra.gmra.mrb[8].mxu1 %vm484_vm3, %v4951_v3 }
  0xcb   : > { %3596 = vmatprep.mubr.msk.bf16.mxu1 %vm484_vm3, %v3183_v23 }
  0xd0   : > { %3669 = vmatmul.mubr.msk.bf16.gmra.mrb[12].mxu0 %vm484_vm3, %v3326_v29 }
  0xd2   : > { %3597 = vmatmul.mubr.msk.bf16.gmra.mrb[12].mxu1 %vm484_vm3, %v3184_v35 }
 0x17d   : > { %v3568_v3 = vpop.f32.mrb[0].mxu1 }
 0x17e   : > { %v1146_v63 = vpop.f32.mrb[1].mxu1 }
 0x17f   : > { %v3569_v14 = vpop.f32.mrb[2].mxu1 }
 0x180   : > { %v1149_v5 = vpop.f32.mrb[3].mxu1 }
 0x185   : > { %v3572_v1 = vpop.f32.mrb[4].mxu1 }
 0x186   : > { %v1162_v13 = vpop.f32.mrb[5].mxu1 }
 0x187   : > { %v3573_v24 = vpop.f32.mrb[6].mxu1 }
 0x188   : > { %v1165_v8 = vpop.f32.mrb[7].mxu1 }
 0x18b   : > { %v3658_v0 = vpop.f32.mrb[0].mxu0 }
 0x18c   : > { %v3674_v32 = vadd.f32 %v3658_v0, %v3568_v3  ;;  %v2620_v27 = vpop.f32.mrb[1].mxu0 }
 0x18d   : > { %v3675_v34 = vadd.f32 %v2620_v27, %v1146_v63  ;;  %v3659_v2 = vpop.f32.mrb[2].mxu0 }
 0x18e   : > { %v3676_v9 = vadd.f32 %v3659_v2, %v3569_v14  ;;  %v2623_v61 = vpop.f32.mrb[3].mxu0  ;;  %v2802_v36 = vmul.f32 %v3674_v32, %v3674_v32 }
 0x18f   : > { %v3677_v6 = vadd.f32 %v2623_v61, %v1149_v5  ;;  %v2800_v22 = vmul.f32 %v3675_v34, %v3675_v34 }
 0x190   : > { %v3390_v42 = vpack.c.bf16 %v3676_v9, %v3674_v32  ;;  %v2803_v31 = vmul.f32 %v3676_v9, %v3676_v9 }
 0x191   : > { %v3385_v7 = vpack.c.bf16 %v3677_v6, %v3675_v34  ;;  %v2779_v33 = vadd.f32 %v3677_v6, %v3675_v34  ;;  %v2801_v25 = vmul.f32 %v3677_v6, %v3677_v6 }
 0x192   : > { %3422 = vst [vmem:[%s5049_s27 + $0x8] sm:$0xff] %v3390_v42  }
 0x193   : > { %3386 = vst [vmem:[%s5049_s27] sm:$0xff] %v3385_v7   ;;  %v2780_v20 = vadd.f32 %v3674_v32, %v2779_v33  ;;  %v2816_v53 = vadd.f32 %v2801_v25, %v2800_v22  ;;  %v3662_v57 = vpop.f32.mrb[4].mxu0 }
 0x194   : > { %v3678_v52 = vadd.f32 %v3662_v57, %v3572_v1  ;;  %v2636_v21 = vpop.f32.mrb[5].mxu0 }
 0x195   : > { %v2817_v39 = vadd.f32 %v2816_v53, %v2802_v36  ;;  %v3679_v26 = vadd.f32 %v2636_v21, %v1162_v13  ;;  %v2781_v55 = vadd.f32 %v3676_v9, %v2780_v20  ;;  %v3663_v19 = vpop.f32.mrb[6].mxu0 }
 0x196   : > { %v3680_v10 = vadd.f32 %v3663_v19, %v3573_v24  ;;  %v2639_v38 = vpop.f32.mrb[7].mxu0  ;;  %v2806_v59 = vmul.f32 %v3678_v52, %v3678_v52 }
 0x197   : > { %v2782_v44 = vadd.f32 %v3679_v26, %v2781_v55  ;;  %v2804_v43 = vmul.f32 %v3679_v26, %v3679_v26  ;;  %v2818_v45 = vadd.f32 %v2817_v39, %v2803_v31  ;;  %v3681_v56 = vadd.f32 %v2639_v38, %v1165_v8 }
 0x198   : > { %v3400_v28 = vpack.c.bf16 %v3680_v10, %v3678_v52  ;;  %v2807_v16 = vmul.f32 %v3680_v10, %v3680_v10 }
 0x199   : > { %v2819_v11 = vadd.f32 %v2818_v45, %v2804_v43  ;;  %v3395_v15 = vpack.c.bf16 %v3681_v56, %v3679_v26  ;;  %v2783_v41 = vadd.f32 %v3681_v56, %v2782_v44  ;;  %v2805_v40 = vmul.f32 %v3681_v56, %v3681_v56 }
 0x19a   : > { %3424 = vst [vmem:[%s5049_s27 + $0x18] sm:$0xff] %v3400_v28  }
 0x19b   : > { %3423 = vst [vmem:[%s5049_s27 + $0x10] sm:$0xff] %v3395_v15   ;;  %v2784_v18 = vadd.f32 %v3678_v52, %v2783_v41  ;;  %v2820_v4 = vadd.f32 %v2819_v11, %v2805_v40  ;;  %v3666_v47 = vpop.f32.mrb[8].mxu0 }
 0x19c   : > { %v2652_v37 = vpop.f32.mrb[9].mxu0 }
 0x19d   : > { %v3594_v51 = vpop.f32.mrb[8].mxu1  ;;  %v2821_v49 = vadd.f32 %v2820_v4, %v2806_v59  ;;  %v2785_v58 = vadd.f32 %v3680_v10, %v2784_v18  ;;  %v3667_v23 = vpop.f32.mrb[10].mxu0 }
 0x19e   : > { %v3682_v30 = vadd.f32 %v3666_v47, %v3594_v51  ;;  %v1560_v12 = vpop.f32.mrb[9].mxu1  ;;  %v2655_v62 = vpop.f32.mrb[11].mxu0 }
 0x19f   : > { %v3683_v46 = vadd.f32 %v2652_v37, %v1560_v12  ;;  %v3595_v54 = vpop.f32.mrb[10].mxu1  ;;  %v2822_v48 = vadd.f32 %v2821_v49, %v2807_v16 }
 0x1a0   : > { %v3684_v50 = vadd.f32 %v3667_v23, %v3595_v54  ;;  %v1563_v60 = vpop.f32.mrb[11].mxu1  ;;  %v2810_v24 = vmul.f32 %v3682_v30, %v3682_v30 }
 0x1a1   : > { %v2786_v17 = vadd.f32 %v3683_v46, %v2785_v58  ;;  %v2808_v29 = vmul.f32 %v3683_v46, %v3683_v46  ;;  %v3685_v35 = vadd.f32 %v2655_v62, %v1563_v60 }
 0x1a2   : > { %v3410_v3 = vpack.c.bf16 %v3684_v50, %v3682_v30  ;;  %v2811_v61 = vmul.f32 %v3684_v50, %v3684_v50 }
 0x1a3   : > { %v2823_v63 = vadd.f32 %v2822_v48, %v2808_v29  ;;  %v3405_v14 = vpack.c.bf16 %v3685_v35, %v3683_v46  ;;  %v2787_v5 = vadd.f32 %v3685_v35, %v2786_v17  ;;  %v2809_v1 = vmul.f32 %v3685_v35, %v3685_v35  ;;  %v3670_v13 = vpop.f32.mrb[12].mxu0 }
 0x1a4   : > { %3426 = vst [vmem:[%s5049_s27 + $0x28] sm:$0xff] %v3410_v3   ;;  %v2668_v27 = vpop.f32.mrb[13].mxu0 }
 0x1a5   : > { %3425 = vst [vmem:[%s5049_s27 + $0x20] sm:$0xff] %v3405_v14   ;;  %v2788_v8 = vadd.f32 %v3682_v30, %v2787_v5  ;;  %v2824_v0 = vadd.f32 %v2823_v63, %v2809_v1  ;;  %v3598_v32 = vpop.f32.mrb[12].mxu1  ;;  %v3671_v9 = vpop.f32.mrb[14].mxu0 }
 0x1a6   : > { %v3686_v34 = vadd.f32 %v3670_v13, %v3598_v32  ;;  %v1576_v2 = vpop.f32.mrb[13].mxu1  ;;  %v2671_v33 = vpop.f32.mrb[15].mxu0 }
 0x1a7   : > { %v2825_v6 = vadd.f32 %v2824_v0, %v2810_v24  ;;  %v3687_v42 = vadd.f32 %v2668_v27, %v1576_v2  ;;  %v2789_v22 = vadd.f32 %v3684_v50, %v2788_v8  ;;  %v3599_v7 = vpop.f32.mrb[14].mxu1 }
 0x1a8   : > { %v3688_v25 = vadd.f32 %v3671_v9, %v3599_v7  ;;  %v1579_v36 = vpop.f32.mrb[15].mxu1  ;;  %v2814_v19 = vmul.f32 %v3686_v34, %v3686_v34 }
 0x1a9   : > { %v2790_v20 = vadd.f32 %v3687_v42, %v2789_v22  ;;  %v2812_v53 = vmul.f32 %v3687_v42, %v3687_v42  ;;  %v2826_v57 = vadd.f32 %v2825_v6, %v2811_v61  ;;  %v3689_v52 = vadd.f32 %v2671_v33, %v1579_v36 }
 0x1aa   : > { %v3420_v21 = vpack.c.bf16 %v3688_v25, %v3686_v34 }
 0x1ab   : > { %v2827_v31 = vadd.f32 %v2826_v57, %v2812_v53  ;;  %v3415_v39 = vpack.c.bf16 %v3689_v52, %v3687_v42  ;;  %v2791_v26 = vadd.f32 %v3689_v52, %v2790_v20  ;;  %v2813_v55 = vmul.f32 %v3689_v52, %v3689_v52 }
 0x1ac   : > { %3428 = vst [vmem:[%s5049_s27 + $0x38] sm:$0xff] %v3420_v21  }
 0x1ad   : > { %3427 = vst [vmem:[%s5049_s27 + $0x30] sm:$0xff] %v3415_v39   ;;  %v2792_v10 = vadd.f32 %v3686_v34, %v2791_v26  ;;  %v2828_v38 = vadd.f32 %v2827_v31, %v2813_v55 }
 0x1ae   : > { %3934 = shalt.err (!%p3931_p6)
}
 0x1af   : > { %s3935_s27 = scalar_lea.hbm %s5063_s13, 1024  ;;  %s3939_s5 = scalar_lea.hbm %s5197_s2, 4096 }
 0x1b0   : > { %p3936_p7 = scmp.ne.s32.totalorder %s5063_s13, %s3935_s27  ;;  %p3940_p11 = scmp.lt.u32.totalorder %s5063_s13, %s5197_s2 }
 0x1b1   : > { %p3941_p12 = scmp.lt.u32.totalorder %s3939_s5, %s3935_s27  ;;  %p3943_p0 = scmp.lt.u32.totalorder %s3935_s27, %s5063_s13 }
 0x1b2   : > { %p3937_p9 = pnand %p3936_p7, %p4160_p3 }
 0x1b3   : > { %p3942_p13 = por %p3941_p12, %p3940_p11 }
 0x1b4   : > { %p3938_p10 = pneg %p3937_p9 }
 0x1b5   : > { %p3944_p1 = por %p3943_p0, %p3942_p13 }
 0x1b7   : > { %p3945_p2 = pnand %p3944_p1, %p3938_p10 }
 0x1b9   : > { %3948 = shalt.err (!%p3945_p2)
}
 0x1ba   : > { %s4078_s30 = smov 64   ;;  %s4079_s8 = smov 4   ;;  %v2815_v44 = vmul.f32 %v3688_v25, %v3688_v25  ;;  %v2793_v43 = vadd.f32 %v3688_v25, %v2792_v10  ;;  %v2829_v45 = vadd.f32 %v2828_v38, %v2814_v19 }
 0x1bb   : > { %3813 = dma.vmem_to_hbm [thread:$0]  (%p4160_p3), %s5065_s9, 1024, %s5063_s13, %s2840_s14, %s4078_s30, %s4078_s30, %s4079_s8  }
 0x1bc   : > { %v2794_v56 = vrot.slane %v2793_v43, 4  ;;  %v2830_v28 = vadd.f32 %v2829_v45, %v2815_v44  ;;  %s3053_s24 = sshll.u32 %s5046_s11, 3  ;;  %s3358_s27 = sshll.u32 %s4063_s19, 1 }
 0x1bd   : > { %s2880_s10 = sadd.s32 %s4059_s18, %s3358_s27  ;;  %s5098_s12 = sand.u32 1, %s3047_s23  }
 0x1be   : > { %v2831_v11 = vrot.slane %v2830_v28, 4  ;;  %v2795_v15 = vadd.f32 %v2794_v56, %v2793_v43  ;;  %s3359_s5 = sshll.u32 %s2880_s10, 7  ;;  %s219_s9 = scalar_lea.vmem [#allocation4], %s3053_s24 }
 0x1bf   : > { %s2884_s13 = sshll.u32 %s219_s9, 4  ;;  %s5100_s14 = scalar_lea.vmem [#allocation6], %s3053_s24  ;;  %s5108_s13 = int_to_ptr.vmem [resolvable:$true] %s2884_s13 }
 0x1c0   : > { %v2796_v41 = vrot.slane %v2795_v15, 2  ;;  %v2832_v40 = vadd.f32 %v2831_v11, %v2830_v28  ;;  %s2899_s19 = sshll.u32 %s5100_s14, 4  ;;  %s5106_s6 = scalar_lea.hbm %s5198_s3, %s3359_s5  ;;  %s5115_s19 = int_to_ptr.vmem [resolvable:$true] %s2899_s19 }
 0x1c1   : > { %s5113_s8 = scalar_lea.hbm %s5199_s4, %s3359_s5  ;;  %s2845_s24 = scalar_lea.sflag [#allocation5], %s5098_s12 }
 0x1c2   : > { %v2797_v59 = vadd.f32 %v2796_v41, %v2795_v15  ;;  %v2833_v18 = vrot.slane %v2832_v40, 2  ;;  %s3949_s27 = scalar_lea.vmem %s5108_s13, 128  ;;  %s4080_s10 = smov [#allocation4]  }
 0x1c3   : > { %p3950_p4 = scmp.ne.s32.totalorder %s5108_s13, %s3949_s27  ;;  %s3953_s11 = sshll.u32 %s4080_s10, 4  ;;  %s3954_s11 = int_to_ptr.vmem [resolvable:$false] %s3953_s11 }
 0x1c4   : > { %v2798_v4 = vrot.slane %v2797_v59, 1  ;;  %v2834_v47 = vadd.f32 %v2833_v18, %v2832_v40  ;;  %s3955_s18 = scalar_lea.vmem %s3954_s11, 256  ;;  %p3956_p7 = scmp.lt.s32.totalorder %s5108_s13, %s3954_s11 }
 0x1c5   : > { %p3951_p5 = pnand %p3950_p4, %p4160_p3  ;;  %p3957_p9 = scmp.lt.s32.totalorder %s3955_s18, %s3949_s27 }
 0x1c6   : > { %v2799_v51 = vadd.f32 %v2798_v4, %v2797_v59  ;;  %v2835_v37 = vrot.slane %v2834_v47, 1 }
 0x1c7   : > { %p3952_p6 = pneg %p3951_p5  ;;  %p3958_p10 = por %p3957_p9, %p3956_p7 }
 0x1c8   : > { %2837 = vst [vmem:[%s219_s9] sm:$0xff] %v2799_v51  ;;  %v2836_v16 = vadd.f32 %v2835_v37, %v2834_v47 }
 0x1c9   : > { %p3959_p11 = pnand %p3958_p10, %p3952_p6 }
 0x1cb   : > { %3962 = shalt.err (!%p3959_p11)
}
 0x1cc   : > { %s3963_s5 = scalar_lea.hbm %s5106_s6, 128  ;;  %s3967_s30 = scalar_lea.hbm %s5198_s3, 512 }
 0x1cd   : > { %p3964_p12 = scmp.ne.s32.totalorder %s5106_s6, %s3963_s5  ;;  %p3968_p1 = scmp.lt.u32.totalorder %s5106_s6, %s5198_s3 }
 0x1ce   : > { %p3969_p2 = scmp.lt.u32.totalorder %s3967_s30, %s3963_s5  ;;  %p3971_p5 = scmp.lt.u32.totalorder %s3963_s5, %s5106_s6 }
 0x1cf   : > { %p3965_p13 = pnand %p3964_p12, %p4160_p3 }
 0x1d0   : > { %p3970_p4 = por %p3969_p2, %p3968_p1 }
 0x1d1   : > { %p3966_p0 = pneg %p3965_p13 }
 0x1d2   : > { %p3972_p6 = por %p3971_p5, %p3970_p4 }
 0x1d4   : > { %p3973_p7 = pnand %p3972_p6, %p3966_p0 }
 0x1d6   : > { %3976 = shalt.err (!%p3973_p7)
}
 0x1d7   : > { %3814 = dma.vmem_to_hbm [thread:$0]  (%p4160_p3), %s5108_s13, 128, %s5106_s6, %s2845_s24   ;;  %2838 = vst [vmem:[%s5100_s14] sm:$0xff] %v2836_v16 }
 0x1d8   : > { %s3977_s27 = scalar_lea.vmem %s5115_s19, 128  ;;  %s4081_s18 = smov [#allocation6]  }
 0x1d9   : > { %p3978_p9 = scmp.ne.s32.totalorder %s5115_s19, %s3977_s27  ;;  %s3981_s5 = sshll.u32 %s4081_s18, 4  ;;  %s3982_s5 = int_to_ptr.vmem [resolvable:$false] %s3981_s5 }
 0x1da   : > { %s3983_s9 = scalar_lea.vmem %s3982_s5, 256  ;;  %p3984_p12 = scmp.lt.s32.totalorder %s5115_s19, %s3982_s5 }
 0x1db   : > { %p3979_p10 = pnand %p3978_p9, %p4160_p3  ;;  %p3985_p13 = scmp.lt.s32.totalorder %s3983_s9, %s3977_s27 }
 0x1dd   : > { %p3980_p11 = pneg %p3979_p10  ;;  %p3986_p0 = por %p3985_p13, %p3984_p12 }
 0x1df   : > { %p3987_p1 = pnand %p3986_p0, %p3980_p11 }
 0x1e1   : > { %3990 = shalt.err (!%p3987_p1)
}
 0x1e2   : > { %s3991_s13 = scalar_lea.hbm %s5113_s8, 128  ;;  %s3995_s23 = scalar_lea.hbm %s5199_s4, 512 }
 0x1e3   : > { %p3992_p2 = scmp.ne.s32.totalorder %s5113_s8, %s3991_s13  ;;  %p3996_p6 = scmp.lt.u32.totalorder %s5113_s8, %s5199_s4 }
 0x1e4   : > { %p3997_p7 = scmp.lt.u32.totalorder %s3995_s23, %s3991_s13  ;;  %p3999_p10 = scmp.lt.u32.totalorder %s3991_s13, %s5113_s8 }
 0x1e5   : > { %p3993_p4 = pnand %p3992_p2, %p4160_p3 }
 0x1e6   : > { %p3998_p9 = por %p3997_p7, %p3996_p6 }
 0x1e7   : > { %p3994_p5 = pneg %p3993_p4 }
 0x1e8   : > { %p4000_p11 = por %p3999_p10, %p3998_p9 }
 0x1ea   : > { %p4001_p12 = pnand %p4000_p11, %p3994_p5 }
 0x1ec   : > { %4004 = shalt.err (!%p4001_p12)
}
 0x1ed   : > { %3815 = dma.vmem_to_hbm [thread:$0]  (%p4160_p3), %s5115_s19, 128, %s5113_s8, %s2845_s24  }
 0x1ee PF: > { %p3829_p13 = scmp.ge.s32.totalorder %s4075_s22, 2  ;;  %s2911_s11 = sand.u32 1, %s4047_s15  }
 0x1ef   : > { %s2912_s27 = scalar_lea.sflag [#allocation3], %s2911_s11 }
 0x1f0   : > { %p3820_p0 = pnand %p3829_p13, %p4171_p8 }
 0x1f2   : > { %4038 = dma.done.wait (!%p3820_p0), %s2912_s27, 1024  }
 0x1f3   : > { %4040 = vsyncadd (!%p3820_p0), %s2912_s27, 4294966272  ;;  %s5225_s18 = sadd.s32 4294967294, %s4075_s22  }
 0x1f4   : > { %s2920_s5 = sand.u32 1, %s5225_s18  }
 0x1f5   : > { %s2921_s28 = scalar_lea.sflag [#allocation5], %s2920_s5 }
 0x1f6   : > { %4042 = dma.done.wait (!%p3820_p0), %s2921_s28, 256  }
 0x1f7   : > { %4044 = vsyncadd (!%p3820_p0), %s2921_s28, 4294967040  ;;  %s21_s22 = sadd.s32 1, %s4075_s22   ;;  %s5226_s15 = smov %s4051_s16 }
 0x1f8   : > { %p18_p3 = scmp.ge.s32.totalorder %s21_s22, 6   ;;  %s5227_s16 = smov %s4055_s17 }
 0x1f9   : > { %s5228_s17 = smov %s4180_s7  ;;  %s5229_s18 = smov %s4067_s20 }
 0x1fa   : > { %s5230_s19 = smov %s4071_s21  ;;  %s5231_s20 = smov %s5234_s25 }
 0x1fb   : > { %s5232_s21 = smov %s5238_s26  ;;  %20 = sbr.rel (!%p18_p3) target bundleno = 7 (0x7), region = 106 }
 0x202   :  { %2935 = vsyncpa [#allocation3], 1 }
 0x203   :  { %2937 = vsyncpa [#allocation3 + $0x1], 1 }
 0x204   :  { %2938 = vsyncpa [#allocation5], 1 }
 0x205   :  { %2940 = vsyncpa [#allocation5 + $0x1], 1 }

</bundles_post_ra>
